<compile_context>
chip_gen: v5e
topology: v5e:2x2
jax: 0.10.0
libtpu: 0.0.40
codegen_flags: <defaults>
</compile_context>

<pallas_src>
import functools

import jax
import jax.numpy as jnp
from jax import lax
from jax.experimental import pallas as pl
from jax.experimental.pallas import tpu as pltpu


def _lecun_tanh(x):
    return 1.7159 * jnp.tanh(0.666 * x)


def _round_up(n, m):
    return ((n + m - 1) // m) * m


def cfc_kernel(
    x_ref,        # (T*Bp, I)   time-major chunk, rows grouped per timestep
    wbb_x_ref,    # (I, BBU)    backbone weight, input part
    wbb_h_ref,    # (H, BBU)    backbone weight, hidden part
    bbb_ref,      # (1, BBU)    backbone bias
    w_heads_ref,  # (BBU, 3H)   fused [ff1 | ff2 | t] head weights (t = Wta + Wtb)
    b_heads_ref,  # (1, 3H)     fused head biases
    seq_out_ref,  # (T*Bp, H)   per-chunk sequence output (time-major)
    h_out_ref,    # (Bp, H)     final hidden state
    xproj_ref,    # VMEM (T*Bp, BBU) f32 : hoisted input projection
    h_scratch,    # VMEM (Bp, H)     f32 : hidden state carried across chunks
    *,
    seq_len,      # static: true sequence length L
    t_chunk,      # static: timesteps per grid step (multiple of 8)
    batch_p,      # static: padded batch Bp (multiple of 8)
    mask_time,    # static bool: last chunk contains padded timesteps
    unroll,       # static int: fori_loop unroll factor
):
    c = pl.program_id(0)

    @pl.when(c == 0)
    def _():
        h_scratch[...] = jnp.zeros_like(h_scratch)

    T, Bp = t_chunk, batch_p
    H = h_out_ref.shape[-1]
    BBU = wbb_x_ref.shape[-1]
    w_dtype = wbb_x_ref.dtype

    # ---- hoisted, once per chunk (off the recurrent critical path) --------
    # Input projection + backbone bias for all T timesteps in one matmul.
    xproj_ref[...] = jnp.dot(
        x_ref[...].astype(w_dtype), wbb_x_ref[...],
        preferred_element_type=jnp.float32,
    ) + jnp.broadcast_to(bbb_ref[...].astype(jnp.float32), (T * Bp, BBU))

    w_bh = wbb_h_ref[...]
    w_heads = w_heads_ref[...]
    b_heads = jnp.broadcast_to(b_heads_ref[...].astype(jnp.float32), (Bp, 3 * H))

    if mask_time:
        valid_steps = seq_len - c * T   # real (unpadded) steps in this chunk

    # ---- recurrence over the chunk -----------------------------------------
    def step(j, h):
        row = pl.multiple_of(j * Bp, 8)
        # backbone: concat([x_t, h]) @ Wbb + b == xproj[t] + h @ Wbb_h
        bb = xproj_ref[pl.ds(row, Bp), :] + jnp.dot(
            h.astype(w_dtype), w_bh, preferred_element_type=jnp.float32)
        bb = _lecun_tanh(bb)                               # (Bp, BBU) f32
        # one matmul for all heads [ff1 | ff2 | t]
        heads = jnp.dot(bb.astype(w_dtype), w_heads,
                        preferred_element_type=jnp.float32) + b_heads
        ff = jnp.tanh(heads[:, : 2 * H])                   # one tanh for ff1|ff2
        t_i = jax.nn.sigmoid(heads[:, 2 * H:])             # ts==1 folded in weights
        ff1 = ff[:, :H]
        ff2 = ff[:, H:]
        # ff1*(1-ti) + ti*ff2 == ff1 + ti*(ff2-ff1)
        h_new = ff1 + t_i * (ff2 - ff1)
        if mask_time:
            h_new = jnp.where(j < valid_steps, h_new, h)
        seq_out_ref[pl.ds(row, Bp), :] = h_new.astype(seq_out_ref.dtype)
        return h_new

    h = lax.fori_loop(0, T, step, h_scratch[...], unroll=unroll)

    h_scratch[...] = h
    # Tiny (Bp, H) store every chunk: independent of writeback timing.
    h_out_ref[...] = h.astype(h_out_ref.dtype)


def cfc_forward(x_blc, params, *, t_chunk=64):
    """x_blc: (B, L, I) batch-first input. Returns (output (B, L, H), h (B, H))."""
    B, L, I = x_blc.shape
    H = params["wff1"].shape[1]
    BBU = params["wbb_x"].shape[1]
    w_dtype = params["wbb_x"].dtype

    # timespans=None -> ts == 1.0, so fold t_a*ts + t_b into one head.
    # TODO(synk): keep Wta/Wtb separate if timespans support is added.
    w_heads = jnp.concatenate(
        [params["wff1"], params["wff2"], params["wta"] + params["wtb"]], axis=1
    ).astype(w_dtype)
    b_heads = jnp.concatenate(
        [params["bff1"], params["bff2"], params["bta"] + params["btb"]], axis=1
    )

    # Sublane-aligned batch and 8-aligned time chunk.
    Bp = max(8, _round_up(B, 8))
    T = min(_round_up(max(t_chunk, 8), 8), _round_up(L, 8))
    num_chunks = pl.cdiv(L, T)
    Lp = num_chunks * T
    mask_time = Lp != L

    # Time-major, flattened (Lp*Bp, I) input: per-chunk blocks are 2-D and
    # per-step slices inside the kernel are aligned sublane-group views.
    x_tm = jnp.swapaxes(x_blc, 0, 1)                        # (L, B, I)
    if Lp != L or Bp != B:
        x_tm = jnp.pad(x_tm, ((0, Lp - L), (0, Bp - B), (0, 0)))
    x_flat = x_tm.reshape(Lp * Bp, I)

    kernel = functools.partial(
        cfc_kernel, seq_len=L, t_chunk=T, batch_p=Bp,
        mask_time=mask_time, unroll=min(8, T))

    grid_spec = pltpu.PrefetchScalarGridSpec(
        num_scalar_prefetch=0,
        grid=(num_chunks,),
        in_specs=[
            pl.BlockSpec((T * Bp, I), lambda c: (c, 0)),     # x chunk (time-major)
            pl.BlockSpec((I, BBU), lambda c: (0, 0)),        # weights: VMEM resident
            pl.BlockSpec((H, BBU), lambda c: (0, 0)),
            pl.BlockSpec((1, BBU), lambda c: (0, 0)),
            pl.BlockSpec((BBU, 3 * H), lambda c: (0, 0)),
            pl.BlockSpec((1, 3 * H), lambda c: (0, 0)),
        ],
        out_specs=[
            pl.BlockSpec((T * Bp, H), lambda c: (c, 0)),     # sequence output chunk
            pl.BlockSpec((Bp, H), lambda c: (0, 0)),         # final hidden state
        ],
        scratch_shapes=[
            pltpu.VMEM((T * Bp, BBU), jnp.float32),          # hoisted x projection
            pltpu.VMEM((Bp, H), jnp.float32),                # h carried across chunks
        ],
    )

    # Explicit VMEM budget only when the estimate exceeds the smallest default
    # scoped limit (16 MiB on v5e). Re-derive against 64 MiB when sizing for v7x.
    wbytes = jnp.dtype(w_dtype).itemsize
    xbytes = jnp.dtype(x_blc.dtype).itemsize
    vmem_est = (
        2 * T * Bp * (I * xbytes + H * 4)                          # x / seq blocks (x2 buffers)
        + 2 * ((I + H + 1) * BBU + (BBU + 1) * 3 * H) * wbytes     # resident weights
        + 2 * Bp * H * 4                                           # final-h block
        + T * Bp * BBU * 4 + Bp * H * 4                            # scratch
        + (1 << 20)                                                # slack
    )
    vmem_limit = int(vmem_est) if vmem_est > (16 << 20) else None

    seq_flat, h_pad = pl.pallas_call(
        kernel,
        grid_spec=grid_spec,
        out_shape=(
            jax.ShapeDtypeStruct((Lp * Bp, H), jnp.float32),
            jax.ShapeDtypeStruct((Bp, H), jnp.float32),
        ),
        compiler_params=pltpu.CompilerParams(
            dimension_semantics=("arbitrary",),   # recurrence over time: sequential
            vmem_limit_bytes=vmem_limit,
        ),
    )(
        x_flat,
        params["wbb_x"],
        params["wbb_h"],
        params["bbb"],
        w_heads,
        b_heads,
    )

    out = jnp.swapaxes(seq_flat.reshape(Lp, Bp, H), 0, 1)[:B, :L]
    return out, h_pad[:B]


def cfc_reference(x_blc, params):
    """Pure-JAX reference matching CfCCell semantics (for correctness check)."""
    B, _, _ = x_blc.shape
    H = params["wff1"].shape[1]

    def step(h, x_t):
        bb = _lecun_tanh(x_t @ params["wbb_x"] + h @ params["wbb_h"] + params["bbb"])
        ff1 = jnp.tanh(bb @ params["wff1"] + params["bff1"])
        ff2 = jnp.tanh(bb @ params["wff2"] + params["bff2"])
        t_a = bb @ params["wta"] + params["bta"]
        t_b = bb @ params["wtb"] + params["btb"]
        ti = jax.nn.sigmoid(t_a * 1.0 + t_b)
        h = ff1 * (1.0 - ti) + ti * ff2
        return h, h

    h0 = jnp.zeros((B, H), jnp.float32)
    h_last, outs = jax.lax.scan(step, h0, jnp.swapaxes(x_blc, 0, 1))
    return jnp.swapaxes(outs, 0, 1), h_last


def _xavier_uniform(key, fan_in, fan_out):
    # torch.nn.init.xavier_uniform_ on a (out, in) weight; stored here as (in, out).
    limit = (6.0 / (fan_in + fan_out)) ** 0.5
    return jax.random.uniform(key, (fan_in, fan_out), jnp.float32, -limit, limit)


def init_params(key, input_size, units, backbone_units):
    I, H, BBU = input_size, units, backbone_units
    keys = jax.random.split(key, 12)
    wbb = _xavier_uniform(keys[0], I + H, BBU)
    bound_bb = 1.0 / (I + H) ** 0.5
    bound_h = 1.0 / BBU ** 0.5
    return {
        "wbb_x": wbb[:I],
        "wbb_h": wbb[I:],
        "bbb": jax.random.uniform(keys[1], (1, BBU), jnp.float32, -bound_bb, bound_bb),
        "wff1": _xavier_uniform(keys[2], BBU, H),
        "bff1": jax.random.uniform(keys[3], (1, H), jnp.float32, -bound_h, bound_h),
        "wff2": _xavier_uniform(keys[4], BBU, H),
        "bff2": jax.random.uniform(keys[5], (1, H), jnp.float32, -bound_h, bound_h),
        "wta": _xavier_uniform(keys[6], BBU, H),
        "bta": jax.random.uniform(keys[7], (1, H), jnp.float32, -bound_h, bound_h),
        "wtb": _xavier_uniform(keys[8], BBU, H),
        "btb": jax.random.uniform(keys[9], (1, H), jnp.float32, -bound_h, bound_h),
    }


if __name__ == "__main__":
    # Small shapes consistent with CfC: batch=2, seq=8, input_size=4, units=32.
    B, L, I, H, BBU = 2, 8, 4, 32, 128

    key = jax.random.PRNGKey(0)
    k_param, k_x, k_x2, k_x3 = jax.random.split(key, 4)
    params = init_params(k_param, I, H, BBU)
    ref_fn = jax.jit(cfc_reference)

    # 1) Single full chunk (T=8, fully unrolled fori_loop), no tail padding.
    x = jax.random.normal(k_x, (B, L, I), jnp.float32)
    fwd = jax.jit(functools.partial(cfc_forward, t_chunk=64))
    out, h_final = fwd(x, params)
    jax.block_until_ready((out, h_final))
    out_ref, h_ref = ref_fn(x, params)
    assert out.shape == (B, L, H) and h_final.shape == (B, H)
    assert jnp.allclose(out, out_ref, atol=3e-4, rtol=3e-4)
    assert jnp.allclose(h_final, h_ref, atol=3e-4, rtol=3e-4)

    # 2) Multi-chunk + ragged tail (L=11, T=8 -> 2 chunks, masked tail, h carry).
    L2 = 11
    x2 = jax.random.normal(k_x2, (B, L2, I), jnp.float32)
    fwd2 = jax.jit(functools.partial(cfc_forward, t_chunk=8))
    out2, h2 = fwd2(x2, params)
    jax.block_until_ready((out2, h2))
    out2_ref, h2_ref = ref_fn(x2, params)
    assert out2.shape == (B, L2, H)
    assert jnp.allclose(out2, out2_ref, atol=3e-4, rtol=3e-4)
    assert jnp.allclose(h2, h2_ref, atol=3e-4, rtol=3e-4)

    # 3) Longer sequence: T=32 chunks, fori_loop(unroll=8), 3 chunks, masked tail.
    L3 = 80
    x3 = jax.random.normal(k_x3, (B, L3, I), jnp.float32)
    fwd3 = jax.jit(functools.partial(cfc_forward, t_chunk=32))
    out3, h3 = fwd3(x3, params)
    jax.block_until_ready((out3, h3))
    out3_ref, h3_ref = ref_fn(x3, params)
    assert out3.shape == (B, L3, H)
    assert jnp.allclose(out3, out3_ref, atol=1.5e-3, rtol=1.5e-3)
    assert jnp.allclose(h3, h3_ref, atol=1.5e-3, rtol=1.5e-3)

    # 4) bf16-weight path (MXU-native on v6e/v7x); carry/accum/epilogue stay f32.
    params_bf16 = jax.tree_util.tree_map(lambda p: p.astype(jnp.bfloat16), params)
    out_bf, h_bf = fwd(x, params_bf16)
    jax.block_until_ready((out_bf, h_bf))
    assert bool(jnp.all(jnp.isfinite(out_bf)))
    assert float(jnp.max(jnp.abs(out_bf - out_ref))) < 0.1

    print("KERNEL_OK")
</pallas_src>

<mosaic_0001>
module attributes {stable_mosaic.version = 11 : i64} {
  func.func @cfc_kernel(%arg0: i32, %arg1: memref<64x4xf32, #tpu.memory_space<vmem>>, %arg2: memref<4x128xf32, #tpu.memory_space<vmem>>, %arg3: memref<32x128xf32, #tpu.memory_space<vmem>>, %arg4: memref<1x128xf32, #tpu.memory_space<vmem>>, %arg5: memref<128x96xf32, #tpu.memory_space<vmem>>, %arg6: memref<1x96xf32, #tpu.memory_space<vmem>>, %arg7: memref<64x32xf32, #tpu.memory_space<vmem>>, %arg8: memref<8x32xf32, #tpu.memory_space<vmem>>, %arg9: memref<64x128xf32, #tpu.memory_space<vmem>>, %arg10: memref<8x32xf32, #tpu.memory_space<vmem>>) attributes {dimension_semantics = [#tpu.dimension_semantics<arbitrary>], iteration_bounds = array<i64: 1>, scalar_prefetch = 0 : i64, scratch_operands = 2 : i64, tpu.core_type = #tpu.core_type<tc>, window_params = [{transform_indices = @transform_0, window_bounds = array<i64: 64, 4>}, {pipeline_mode = #tpu.pipeline_mode<synchronous>, transform_indices = @transform_1, window_bounds = array<i64: 4, 128>}, {pipeline_mode = #tpu.pipeline_mode<synchronous>, transform_indices = @transform_2, window_bounds = array<i64: 32, 128>}, {pipeline_mode = #tpu.pipeline_mode<synchronous>, transform_indices = @transform_3, window_bounds = array<i64: 1, 128>}, {pipeline_mode = #tpu.pipeline_mode<synchronous>, transform_indices = @transform_4, window_bounds = array<i64: 128, 96>}, {pipeline_mode = #tpu.pipeline_mode<synchronous>, transform_indices = @transform_5, window_bounds = array<i64: 1, 96>}, {transform_indices = @transform_6, window_bounds = array<i64: 64, 32>}, {pipeline_mode = #tpu.pipeline_mode<synchronous>, transform_indices = @transform_7, window_bounds = array<i64: 8, 32>}]} {
    %c0_i32 = arith.constant 0 : i32
    %0 = arith.cmpi eq, %arg0, %c0_i32 : i32
    %1 = arith.extui %0 : i1 to i32
    %c0_i32_0 = arith.constant 0 : i32
    %2 = arith.cmpi ne, %1, %c0_i32_0 : i32
    scf.if %2 {
      %cst_85 = arith.constant 0.000000e+00 : f32
      %243 = vector.broadcast %cst_85 : f32 to vector<8x32xf32>
      %c0_86 = arith.constant 0 : index
      %c0_87 = arith.constant 0 : index
      %244 = vector.load %arg10[%c0_86, %c0_87] : memref<8x32xf32, #tpu.memory_space<vmem>>, vector<8x32xf32>
      tpu.vector_store %arg10[%c0_86, %c0_87], %243 {strides = array<i32>} : memref<8x32xf32, #tpu.memory_space<vmem>>, vector<8x32xf32>,
    } else {
    }
    %c0 = arith.constant 0 : index
    %c0_1 = arith.constant 0 : index
    %3 = vector.load %arg1[%c0, %c0_1] : memref<64x4xf32, #tpu.memory_space<vmem>>, vector<64x4xf32>
    %c0_2 = arith.constant 0 : index
    %c0_3 = arith.constant 0 : index
    %4 = vector.load %arg2[%c0_2, %c0_3] : memref<4x128xf32, #tpu.memory_space<vmem>>, vector<4x128xf32>
    %cst = arith.constant dense<0.000000e+00> : vector<64x128xf32>
    %5 = tpu.matmul %3, %4, %cst {dimension_numbers = #tpu.dot_dimension_numbers<[1], [0], [0], [1], [0, 0, 1, 1], [], []>} : vector<64x4xf32>, vector<4x128xf32>, vector<64x128xf32> -> vector<64x128xf32>
    %c0_4 = arith.constant 0 : index
    %c0_5 = arith.constant 0 : index
    %6 = vector.load %arg4[%c0_4, %c0_5] : memref<1x128xf32, #tpu.memory_space<vmem>>, vector<1x128xf32>
    %7 = vector.shape_cast %6 : vector<1x128xf32> to vector<1x128xf32>
    %8 = vector.broadcast %7 : vector<1x128xf32> to vector<64x128xf32>
    %9 = arith.addf %5, %8 : vector<64x128xf32>
    %c0_6 = arith.constant 0 : index
    %c0_7 = arith.constant 0 : index
    %10 = vector.load %arg9[%c0_6, %c0_7] : memref<64x128xf32, #tpu.memory_space<vmem>>, vector<64x128xf32>
    tpu.vector_store %arg9[%c0_6, %c0_7], %9 {strides = array<i32>} : memref<64x128xf32, #tpu.memory_space<vmem>>, vector<64x128xf32>,
    %c0_8 = arith.constant 0 : index
    %c0_9 = arith.constant 0 : index
    %11 = vector.load %arg3[%c0_8, %c0_9] : memref<32x128xf32, #tpu.memory_space<vmem>>, vector<32x128xf32>
    %c0_10 = arith.constant 0 : index
    %c0_11 = arith.constant 0 : index
    %12 = vector.load %arg5[%c0_10, %c0_11] : memref<128x96xf32, #tpu.memory_space<vmem>>, vector<128x96xf32>
    %c0_12 = arith.constant 0 : index
    %c0_13 = arith.constant 0 : index
    %13 = vector.load %arg6[%c0_12, %c0_13] : memref<1x96xf32, #tpu.memory_space<vmem>>, vector<1x96xf32>
    %14 = vector.shape_cast %13 : vector<1x96xf32> to vector<1x96xf32>
    %15 = vector.broadcast %14 : vector<1x96xf32> to vector<8x96xf32>
    %c0_14 = arith.constant 0 : index
    %c0_15 = arith.constant 0 : index
    %16 = vector.load %arg10[%c0_14, %c0_15] : memref<8x32xf32, #tpu.memory_space<vmem>>, vector<8x32xf32>
    %c0_i32_16 = arith.constant 0 : i32
    %c8_i32 = arith.constant 8 : i32
    %17 = arith.muli %c0_i32_16, %c8_i32 : i32
    %18 = tpu.assume_multiple %17, 8 : i32
    %19 = arith.index_cast %18 : i32 to index
    %c0_17 = arith.constant 0 : index
    %20 = vector.load %arg9[%19, %c0_17] : memref<64x128xf32, #tpu.memory_space<vmem>>, vector<8x128xf32>
    %cst_18 = arith.constant dense<0.000000e+00> : vector<8x128xf32>
    %21 = tpu.matmul %16, %11, %cst_18 {dimension_numbers = #tpu.dot_dimension_numbers<[1], [0], [0], [1], [0, 0, 1, 1], [], []>} : vector<8x32xf32>, vector<32x128xf32>, vector<8x128xf32> -> vector<8x128xf32>
    %22 = arith.addf %20, %21 : vector<8x128xf32>
    %cst_19 = arith.constant 6.660000e-01 : f32
    %23 = vector.broadcast %cst_19 : f32 to vector<8x128xf32>
    %24 = arith.mulf %23, %22 : vector<8x128xf32>
    %25 = math.tanh %24 : vector<8x128xf32>
    %cst_20 = arith.constant 1.715900e+00 : f32
    %26 = vector.broadcast %cst_20 : f32 to vector<8x128xf32>
    %27 = arith.mulf %26, %25 : vector<8x128xf32>
    %cst_21 = arith.constant dense<0.000000e+00> : vector<8x96xf32>
    %28 = tpu.matmul %27, %12, %cst_21 {dimension_numbers = #tpu.dot_dimension_numbers<[1], [0], [0], [1], [0, 0, 1, 1], [], []>} : vector<8x128xf32>, vector<128x96xf32>, vector<8x96xf32> -> vector<8x96xf32>
    %29 = arith.addf %28, %15 : vector<8x96xf32>
    %30 = vector.extract_strided_slice %29 {offsets = [0, 0], sizes = [8, 64], strides = [1, 1]} : vector<8x96xf32> to vector<8x64xf32>
    %31 = math.tanh %30 : vector<8x64xf32>
    %32 = vector.extract_strided_slice %29 {offsets = [0, 64], sizes = [8, 32], strides = [1, 1]} : vector<8x96xf32> to vector<8x32xf32>
    %33 = arith.negf %32 : vector<8x32xf32>
    %34 = math.exp %33 : vector<8x32xf32>
    %cst_22 = arith.constant 1.000000e+00 : f32
    %35 = vector.broadcast %cst_22 : f32 to vector<8x32xf32>
    %36 = arith.addf %35, %34 : vector<8x32xf32>
    %37 = arith.divf %35, %36 : vector<8x32xf32>
    %38 = vector.extract_strided_slice %31 {offsets = [0, 0], sizes = [8, 32], strides = [1, 1]} : vector<8x64xf32> to vector<8x32xf32>
    %39 = vector.extract_strided_slice %31 {offsets = [0, 32], sizes = [8, 32], strides = [1, 1]} : vector<8x64xf32> to vector<8x32xf32>
    %40 = arith.subf %39, %38 : vector<8x32xf32>
    %41 = arith.mulf %37, %40 : vector<8x32xf32>
    %42 = arith.addf %38, %41 : vector<8x32xf32>
    %43 = arith.index_cast %18 : i32 to index
    %c0_23 = arith.constant 0 : index
    %44 = vector.load %arg7[%43, %c0_23] : memref<64x32xf32, #tpu.memory_space<vmem>>, vector<8x32xf32>
    tpu.vector_store %arg7[%43, %c0_23], %42 {strides = array<i32>} : memref<64x32xf32, #tpu.memory_space<vmem>>, vector<8x32xf32>,
    %c1_i32 = arith.constant 1 : i32
    %c8_i32_24 = arith.constant 8 : i32
    %45 = arith.muli %c1_i32, %c8_i32_24 : i32
    %46 = tpu.assume_multiple %45, 8 : i32
    %47 = arith.index_cast %46 : i32 to index
    %c0_25 = arith.constant 0 : index
    %48 = vector.load %arg9[%47, %c0_25] : memref<64x128xf32, #tpu.memory_space<vmem>>, vector<8x128xf32>
    %cst_26 = arith.constant dense<0.000000e+00> : vector<8x128xf32>
    %49 = tpu.matmul %42, %11, %cst_26 {dimension_numbers = #tpu.dot_dimension_numbers<[1], [0], [0], [1], [0, 0, 1, 1], [], []>} : vector<8x32xf32>, vector<32x128xf32>, vector<8x128xf32> -> vector<8x128xf32>
    %50 = arith.addf %48, %49 : vector<8x128xf32>
    %cst_27 = arith.constant 6.660000e-01 : f32
    %51 = vector.broadcast %cst_27 : f32 to vector<8x128xf32>
    %52 = arith.mulf %51, %50 : vector<8x128xf32>
    %53 = math.tanh %52 : vector<8x128xf32>
    %cst_28 = arith.constant 1.715900e+00 : f32
    %54 = vector.broadcast %cst_28 : f32 to vector<8x128xf32>
    %55 = arith.mulf %54, %53 : vector<8x128xf32>
    %cst_29 = arith.constant dense<0.000000e+00> : vector<8x96xf32>
    %56 = tpu.matmul %55, %12, %cst_29 {dimension_numbers = #tpu.dot_dimension_numbers<[1], [0], [0], [1], [0, 0, 1, 1], [], []>} : vector<8x128xf32>, vector<128x96xf32>, vector<8x96xf32> -> vector<8x96xf32>
    %57 = arith.addf %56, %15 : vector<8x96xf32>
    %58 = vector.extract_strided_slice %57 {offsets = [0, 0], sizes = [8, 64], strides = [1, 1]} : vector<8x96xf32> to vector<8x64xf32>
    %59 = math.tanh %58 : vector<8x64xf32>
    %60 = vector.extract_strided_slice %57 {offsets = [0, 64], sizes = [8, 32], strides = [1, 1]} : vector<8x96xf32> to vector<8x32xf32>
    %61 = arith.negf %60 : vector<8x32xf32>
    %62 = math.exp %61 : vector<8x32xf32>
    %cst_30 = arith.constant 1.000000e+00 : f32
    %63 = vector.broadcast %cst_30 : f32 to vector<8x32xf32>
    %64 = arith.addf %63, %62 : vector<8x32xf32>
    %65 = arith.divf %63, %64 : vector<8x32xf32>
    %66 = vector.extract_strided_slice %59 {offsets = [0, 0], sizes = [8, 32], strides = [1, 1]} : vector<8x64xf32> to vector<8x32xf32>
    %67 = vector.extract_strided_slice %59 {offsets = [0, 32], sizes = [8, 32], strides = [1, 1]} : vector<8x64xf32> to vector<8x32xf32>
    %68 = arith.subf %67, %66 : vector<8x32xf32>
    %69 = arith.mulf %65, %68 : vector<8x32xf32>
    %70 = arith.addf %66, %69 : vector<8x32xf32>
    %71 = arith.index_cast %46 : i32 to index
    %c0_31 = arith.constant 0 : index
    %72 = vector.load %arg7[%71, %c0_31] : memref<64x32xf32, #tpu.memory_space<vmem>>, vector<8x32xf32>
    tpu.vector_store %arg7[%71, %c0_31], %70 {strides = array<i32>} : memref<64x32xf32, #tpu.memory_space<vmem>>, vector<8x32xf32>,
    %c2_i32 = arith.constant 2 : i32
    %c8_i32_32 = arith.constant 8 : i32
    %73 = arith.muli %c2_i32, %c8_i32_32 : i32
    %74 = tpu.assume_multiple %73, 8 : i32
    %75 = arith.index_cast %74 : i32 to index
    %c0_33 = arith.constant 0 : index
    %76 = vector.load %arg9[%75, %c0_33] : memref<64x128xf32, #tpu.memory_space<vmem>>, vector<8x128xf32>
    %cst_34 = arith.constant dense<0.000000e+00> : vector<8x128xf32>
    %77 = tpu.matmul %70, %11, %cst_34 {dimension_numbers = #tpu.dot_dimension_numbers<[1], [0], [0], [1], [0, 0, 1, 1], [], []>} : vector<8x32xf32>, vector<32x128xf32>, vector<8x128xf32> -> vector<8x128xf32>
    %78 = arith.addf %76, %77 : vector<8x128xf32>
    %cst_35 = arith.constant 6.660000e-01 : f32
    %79 = vector.broadcast %cst_35 : f32 to vector<8x128xf32>
    %80 = arith.mulf %79, %78 : vector<8x128xf32>
    %81 = math.tanh %80 : vector<8x128xf32>
    %cst_36 = arith.constant 1.715900e+00 : f32
    %82 = vector.broadcast %cst_36 : f32 to vector<8x128xf32>
    %83 = arith.mulf %82, %81 : vector<8x128xf32>
    %cst_37 = arith.constant dense<0.000000e+00> : vector<8x96xf32>
    %84 = tpu.matmul %83, %12, %cst_37 {dimension_numbers = #tpu.dot_dimension_numbers<[1], [0], [0], [1], [0, 0, 1, 1], [], []>} : vector<8x128xf32>, vector<128x96xf32>, vector<8x96xf32> -> vector<8x96xf32>
    %85 = arith.addf %84, %15 : vector<8x96xf32>
    %86 = vector.extract_strided_slice %85 {offsets = [0, 0], sizes = [8, 64], strides = [1, 1]} : vector<8x96xf32> to vector<8x64xf32>
    %87 = math.tanh %86 : vector<8x64xf32>
    %88 = vector.extract_strided_slice %85 {offsets = [0, 64], sizes = [8, 32], strides = [1, 1]} : vector<8x96xf32> to vector<8x32xf32>
    %89 = arith.negf %88 : vector<8x32xf32>
    %90 = math.exp %89 : vector<8x32xf32>
    %cst_38 = arith.constant 1.000000e+00 : f32
    %91 = vector.broadcast %cst_38 : f32 to vector<8x32xf32>
    %92 = arith.addf %91, %90 : vector<8x32xf32>
    %93 = arith.divf %91, %92 : vector<8x32xf32>
    %94 = vector.extract_strided_slice %87 {offsets = [0, 0], sizes = [8, 32], strides = [1, 1]} : vector<8x64xf32> to vector<8x32xf32>
    %95 = vector.extract_strided_slice %87 {offsets = [0, 32], sizes = [8, 32], strides = [1, 1]} : vector<8x64xf32> to vector<8x32xf32>
    %96 = arith.subf %95, %94 : vector<8x32xf32>
    %97 = arith.mulf %93, %96 : vector<8x32xf32>
    %98 = arith.addf %94, %97 : vector<8x32xf32>
    %99 = arith.index_cast %74 : i32 to index
    %c0_39 = arith.constant 0 : index
    %100 = vector.load %arg7[%99, %c0_39] : memref<64x32xf32, #tpu.memory_space<vmem>>, vector<8x32xf32>
    tpu.vector_store %arg7[%99, %c0_39], %98 {strides = array<i32>} : memref<64x32xf32, #tpu.memory_space<vmem>>, vector<8x32xf32>,
    %c3_i32 = arith.constant 3 : i32
    %c8_i32_40 = arith.constant 8 : i32
    %101 = arith.muli %c3_i32, %c8_i32_40 : i32
    %102 = tpu.assume_multiple %101, 8 : i32
    %103 = arith.index_cast %102 : i32 to index
    %c0_41 = arith.constant 0 : index
    %104 = vector.load %arg9[%103, %c0_41] : memref<64x128xf32, #tpu.memory_space<vmem>>, vector<8x128xf32>
    %cst_42 = arith.constant dense<0.000000e+00> : vector<8x128xf32>
    %105 = tpu.matmul %98, %11, %cst_42 {dimension_numbers = #tpu.dot_dimension_numbers<[1], [0], [0], [1], [0, 0, 1, 1], [], []>} : vector<8x32xf32>, vector<32x128xf32>, vector<8x128xf32> -> vector<8x128xf32>
    %106 = arith.addf %104, %105 : vector<8x128xf32>
    %cst_43 = arith.constant 6.660000e-01 : f32
    %107 = vector.broadcast %cst_43 : f32 to vector<8x128xf32>
    %108 = arith.mulf %107, %106 : vector<8x128xf32>
    %109 = math.tanh %108 : vector<8x128xf32>
    %cst_44 = arith.constant 1.715900e+00 : f32
    %110 = vector.broadcast %cst_44 : f32 to vector<8x128xf32>
    %111 = arith.mulf %110, %109 : vector<8x128xf32>
    %cst_45 = arith.constant dense<0.000000e+00> : vector<8x96xf32>
    %112 = tpu.matmul %111, %12, %cst_45 {dimension_numbers = #tpu.dot_dimension_numbers<[1], [0], [0], [1], [0, 0, 1, 1], [], []>} : vector<8x128xf32>, vector<128x96xf32>, vector<8x96xf32> -> vector<8x96xf32>
    %113 = arith.addf %112, %15 : vector<8x96xf32>
    %114 = vector.extract_strided_slice %113 {offsets = [0, 0], sizes = [8, 64], strides = [1, 1]} : vector<8x96xf32> to vector<8x64xf32>
    %115 = math.tanh %114 : vector<8x64xf32>
    %116 = vector.extract_strided_slice %113 {offsets = [0, 64], sizes = [8, 32], strides = [1, 1]} : vector<8x96xf32> to vector<8x32xf32>
    %117 = arith.negf %116 : vector<8x32xf32>
    %118 = math.exp %117 : vector<8x32xf32>
    %cst_46 = arith.constant 1.000000e+00 : f32
    %119 = vector.broadcast %cst_46 : f32 to vector<8x32xf32>
    %120 = arith.addf %119, %118 : vector<8x32xf32>
    %121 = arith.divf %119, %120 : vector<8x32xf32>
    %122 = vector.extract_strided_slice %115 {offsets = [0, 0], sizes = [8, 32], strides = [1, 1]} : vector<8x64xf32> to vector<8x32xf32>
    %123 = vector.extract_strided_slice %115 {offsets = [0, 32], sizes = [8, 32], strides = [1, 1]} : vector<8x64xf32> to vector<8x32xf32>
    %124 = arith.subf %123, %122 : vector<8x32xf32>
    %125 = arith.mulf %121, %124 : vector<8x32xf32>
    %126 = arith.addf %122, %125 : vector<8x32xf32>
    %127 = arith.index_cast %102 : i32 to index
    %c0_47 = arith.constant 0 : index
    %128 = vector.load %arg7[%127, %c0_47] : memref<64x32xf32, #tpu.memory_space<vmem>>, vector<8x32xf32>
    tpu.vector_store %arg7[%127, %c0_47], %126 {strides = array<i32>} : memref<64x32xf32, #tpu.memory_space<vmem>>, vector<8x32xf32>,
    %c4_i32 = arith.constant 4 : i32
    %c8_i32_48 = arith.constant 8 : i32
    %129 = arith.muli %c4_i32, %c8_i32_48 : i32
    %130 = tpu.assume_multiple %129, 8 : i32
    %131 = arith.index_cast %130 : i32 to index
    %c0_49 = arith.constant 0 : index
    %132 = vector.load %arg9[%131, %c0_49] : memref<64x128xf32, #tpu.memory_space<vmem>>, vector<8x128xf32>
    %cst_50 = arith.constant dense<0.000000e+00> : vector<8x128xf32>
    %133 = tpu.matmul %126, %11, %cst_50 {dimension_numbers = #tpu.dot_dimension_numbers<[1], [0], [0], [1], [0, 0, 1, 1], [], []>} : vector<8x32xf32>, vector<32x128xf32>, vector<8x128xf32> -> vector<8x128xf32>
    %134 = arith.addf %132, %133 : vector<8x128xf32>
    %cst_51 = arith.constant 6.660000e-01 : f32
    %135 = vector.broadcast %cst_51 : f32 to vector<8x128xf32>
    %136 = arith.mulf %135, %134 : vector<8x128xf32>
    %137 = math.tanh %136 : vector<8x128xf32>
    %cst_52 = arith.constant 1.715900e+00 : f32
    %138 = vector.broadcast %cst_52 : f32 to vector<8x128xf32>
    %139 = arith.mulf %138, %137 : vector<8x128xf32>
    %cst_53 = arith.constant dense<0.000000e+00> : vector<8x96xf32>
    %140 = tpu.matmul %139, %12, %cst_53 {dimension_numbers = #tpu.dot_dimension_numbers<[1], [0], [0], [1], [0, 0, 1, 1], [], []>} : vector<8x128xf32>, vector<128x96xf32>, vector<8x96xf32> -> vector<8x96xf32>
    %141 = arith.addf %140, %15 : vector<8x96xf32>
    %142 = vector.extract_strided_slice %141 {offsets = [0, 0], sizes = [8, 64], strides = [1, 1]} : vector<8x96xf32> to vector<8x64xf32>
    %143 = math.tanh %142 : vector<8x64xf32>
    %144 = vector.extract_strided_slice %141 {offsets = [0, 64], sizes = [8, 32], strides = [1, 1]} : vector<8x96xf32> to vector<8x32xf32>
    %145 = arith.negf %144 : vector<8x32xf32>
    %146 = math.exp %145 : vector<8x32xf32>
    %cst_54 = arith.constant 1.000000e+00 : f32
    %147 = vector.broadcast %cst_54 : f32 to vector<8x32xf32>
    %148 = arith.addf %147, %146 : vector<8x32xf32>
    %149 = arith.divf %147, %148 : vector<8x32xf32>
    %150 = vector.extract_strided_slice %143 {offsets = [0, 0], sizes = [8, 32], strides = [1, 1]} : vector<8x64xf32> to vector<8x32xf32>
    %151 = vector.extract_strided_slice %143 {offsets = [0, 32], sizes = [8, 32], strides = [1, 1]} : vector<8x64xf32> to vector<8x32xf32>
    %152 = arith.subf %151, %150 : vector<8x32xf32>
    %153 = arith.mulf %149, %152 : vector<8x32xf32>
    %154 = arith.addf %150, %153 : vector<8x32xf32>
    %155 = arith.index_cast %130 : i32 to index
    %c0_55 = arith.constant 0 : index
    %156 = vector.load %arg7[%155, %c0_55] : memref<64x32xf32, #tpu.memory_space<vmem>>, vector<8x32xf32>
    tpu.vector_store %arg7[%155, %c0_55], %154 {strides = array<i32>} : memref<64x32xf32, #tpu.memory_space<vmem>>, vector<8x32xf32>,
    %c5_i32 = arith.constant 5 : i32
    %c8_i32_56 = arith.constant 8 : i32
    %157 = arith.muli %c5_i32, %c8_i32_56 : i32
    %158 = tpu.assume_multiple %157, 8 : i32
    %159 = arith.index_cast %158 : i32 to index
    %c0_57 = arith.constant 0 : index
    %160 = vector.load %arg9[%159, %c0_57] : memref<64x128xf32, #tpu.memory_space<vmem>>, vector<8x128xf32>
    %cst_58 = arith.constant dense<0.000000e+00> : vector<8x128xf32>
    %161 = tpu.matmul %154, %11, %cst_58 {dimension_numbers = #tpu.dot_dimension_numbers<[1], [0], [0], [1], [0, 0, 1, 1], [], []>} : vector<8x32xf32>, vector<32x128xf32>, vector<8x128xf32> -> vector<8x128xf32>
    %162 = arith.addf %160, %161 : vector<8x128xf32>
    %cst_59 = arith.constant 6.660000e-01 : f32
    %163 = vector.broadcast %cst_59 : f32 to vector<8x128xf32>
    %164 = arith.mulf %163, %162 : vector<8x128xf32>
    %165 = math.tanh %164 : vector<8x128xf32>
    %cst_60 = arith.constant 1.715900e+00 : f32
    %166 = vector.broadcast %cst_60 : f32 to vector<8x128xf32>
    %167 = arith.mulf %166, %165 : vector<8x128xf32>
    %cst_61 = arith.constant dense<0.000000e+00> : vector<8x96xf32>
    %168 = tpu.matmul %167, %12, %cst_61 {dimension_numbers = #tpu.dot_dimension_numbers<[1], [0], [0], [1], [0, 0, 1, 1], [], []>} : vector<8x128xf32>, vector<128x96xf32>, vector<8x96xf32> -> vector<8x96xf32>
    %169 = arith.addf %168, %15 : vector<8x96xf32>
    %170 = vector.extract_strided_slice %169 {offsets = [0, 0], sizes = [8, 64], strides = [1, 1]} : vector<8x96xf32> to vector<8x64xf32>
    %171 = math.tanh %170 : vector<8x64xf32>
    %172 = vector.extract_strided_slice %169 {offsets = [0, 64], sizes = [8, 32], strides = [1, 1]} : vector<8x96xf32> to vector<8x32xf32>
    %173 = arith.negf %172 : vector<8x32xf32>
    %174 = math.exp %173 : vector<8x32xf32>
    %cst_62 = arith.constant 1.000000e+00 : f32
    %175 = vector.broadcast %cst_62 : f32 to vector<8x32xf32>
    %176 = arith.addf %175, %174 : vector<8x32xf32>
    %177 = arith.divf %175, %176 : vector<8x32xf32>
    %178 = vector.extract_strided_slice %171 {offsets = [0, 0], sizes = [8, 32], strides = [1, 1]} : vector<8x64xf32> to vector<8x32xf32>
    %179 = vector.extract_strided_slice %171 {offsets = [0, 32], sizes = [8, 32], strides = [1, 1]} : vector<8x64xf32> to vector<8x32xf32>
    %180 = arith.subf %179, %178 : vector<8x32xf32>
    %181 = arith.mulf %177, %180 : vector<8x32xf32>
    %182 = arith.addf %178, %181 : vector<8x32xf32>
    %183 = arith.index_cast %158 : i32 to index
    %c0_63 = arith.constant 0 : index
    %184 = vector.load %arg7[%183, %c0_63] : memref<64x32xf32, #tpu.memory_space<vmem>>, vector<8x32xf32>
    tpu.vector_store %arg7[%183, %c0_63], %182 {strides = array<i32>} : memref<64x32xf32, #tpu.memory_space<vmem>>, vector<8x32xf32>,
    %c6_i32 = arith.constant 6 : i32
    %c8_i32_64 = arith.constant 8 : i32
    %185 = arith.muli %c6_i32, %c8_i32_64 : i32
    %186 = tpu.assume_multiple %185, 8 : i32
    %187 = arith.index_cast %186 : i32 to index
    %c0_65 = arith.constant 0 : index
    %188 = vector.load %arg9[%187, %c0_65] : memref<64x128xf32, #tpu.memory_space<vmem>>, vector<8x128xf32>
    %cst_66 = arith.constant dense<0.000000e+00> : vector<8x128xf32>
    %189 = tpu.matmul %182, %11, %cst_66 {dimension_numbers = #tpu.dot_dimension_numbers<[1], [0], [0], [1], [0, 0, 1, 1], [], []>} : vector<8x32xf32>, vector<32x128xf32>, vector<8x128xf32> -> vector<8x128xf32>
    %190 = arith.addf %188, %189 : vector<8x128xf32>
    %cst_67 = arith.constant 6.660000e-01 : f32
    %191 = vector.broadcast %cst_67 : f32 to vector<8x128xf32>
    %192 = arith.mulf %191, %190 : vector<8x128xf32>
    %193 = math.tanh %192 : vector<8x128xf32>
    %cst_68 = arith.constant 1.715900e+00 : f32
    %194 = vector.broadcast %cst_68 : f32 to vector<8x128xf32>
    %195 = arith.mulf %194, %193 : vector<8x128xf32>
    %cst_69 = arith.constant dense<0.000000e+00> : vector<8x96xf32>
    %196 = tpu.matmul %195, %12, %cst_69 {dimension_numbers = #tpu.dot_dimension_numbers<[1], [0], [0], [1], [0, 0, 1, 1], [], []>} : vector<8x128xf32>, vector<128x96xf32>, vector<8x96xf32> -> vector<8x96xf32>
    %197 = arith.addf %196, %15 : vector<8x96xf32>
    %198 = vector.extract_strided_slice %197 {offsets = [0, 0], sizes = [8, 64], strides = [1, 1]} : vector<8x96xf32> to vector<8x64xf32>
    %199 = math.tanh %198 : vector<8x64xf32>
    %200 = vector.extract_strided_slice %197 {offsets = [0, 64], sizes = [8, 32], strides = [1, 1]} : vector<8x96xf32> to vector<8x32xf32>
    %201 = arith.negf %200 : vector<8x32xf32>
    %202 = math.exp %201 : vector<8x32xf32>
    %cst_70 = arith.constant 1.000000e+00 : f32
    %203 = vector.broadcast %cst_70 : f32 to vector<8x32xf32>
    %204 = arith.addf %203, %202 : vector<8x32xf32>
    %205 = arith.divf %203, %204 : vector<8x32xf32>
    %206 = vector.extract_strided_slice %199 {offsets = [0, 0], sizes = [8, 32], strides = [1, 1]} : vector<8x64xf32> to vector<8x32xf32>
    %207 = vector.extract_strided_slice %199 {offsets = [0, 32], sizes = [8, 32], strides = [1, 1]} : vector<8x64xf32> to vector<8x32xf32>
    %208 = arith.subf %207, %206 : vector<8x32xf32>
    %209 = arith.mulf %205, %208 : vector<8x32xf32>
    %210 = arith.addf %206, %209 : vector<8x32xf32>
    %211 = arith.index_cast %186 : i32 to index
    %c0_71 = arith.constant 0 : index
    %212 = vector.load %arg7[%211, %c0_71] : memref<64x32xf32, #tpu.memory_space<vmem>>, vector<8x32xf32>
    tpu.vector_store %arg7[%211, %c0_71], %210 {strides = array<i32>} : memref<64x32xf32, #tpu.memory_space<vmem>>, vector<8x32xf32>,
    %c7_i32 = arith.constant 7 : i32
    %c8_i32_72 = arith.constant 8 : i32
    %213 = arith.muli %c7_i32, %c8_i32_72 : i32
    %214 = tpu.assume_multiple %213, 8 : i32
    %215 = arith.index_cast %214 : i32 to index
    %c0_73 = arith.constant 0 : index
    %216 = vector.load %arg9[%215, %c0_73] : memref<64x128xf32, #tpu.memory_space<vmem>>, vector<8x128xf32>
    %cst_74 = arith.constant dense<0.000000e+00> : vector<8x128xf32>
    %217 = tpu.matmul %210, %11, %cst_74 {dimension_numbers = #tpu.dot_dimension_numbers<[1], [0], [0], [1], [0, 0, 1, 1], [], []>} : vector<8x32xf32>, vector<32x128xf32>, vector<8x128xf32> -> vector<8x128xf32>
    %218 = arith.addf %216, %217 : vector<8x128xf32>
    %cst_75 = arith.constant 6.660000e-01 : f32
    %219 = vector.broadcast %cst_75 : f32 to vector<8x128xf32>
    %220 = arith.mulf %219, %218 : vector<8x128xf32>
    %221 = math.tanh %220 : vector<8x128xf32>
    %cst_76 = arith.constant 1.715900e+00 : f32
    %222 = vector.broadcast %cst_76 : f32 to vector<8x128xf32>
    %223 = arith.mulf %222, %221 : vector<8x128xf32>
    %cst_77 = arith.constant dense<0.000000e+00> : vector<8x96xf32>
    %224 = tpu.matmul %223, %12, %cst_77 {dimension_numbers = #tpu.dot_dimension_numbers<[1], [0], [0], [1], [0, 0, 1, 1], [], []>} : vector<8x128xf32>, vector<128x96xf32>, vector<8x96xf32> -> vector<8x96xf32>
    %225 = arith.addf %224, %15 : vector<8x96xf32>
    %226 = vector.extract_strided_slice %225 {offsets = [0, 0], sizes = [8, 64], strides = [1, 1]} : vector<8x96xf32> to vector<8x64xf32>
    %227 = math.tanh %226 : vector<8x64xf32>
    %228 = vector.extract_strided_slice %225 {offsets = [0, 64], sizes = [8, 32], strides = [1, 1]} : vector<8x96xf32> to vector<8x32xf32>
    %229 = arith.negf %228 : vector<8x32xf32>
    %230 = math.exp %229 : vector<8x32xf32>
    %cst_78 = arith.constant 1.000000e+00 : f32
    %231 = vector.broadcast %cst_78 : f32 to vector<8x32xf32>
    %232 = arith.addf %231, %230 : vector<8x32xf32>
    %233 = arith.divf %231, %232 : vector<8x32xf32>
    %234 = vector.extract_strided_slice %227 {offsets = [0, 0], sizes = [8, 32], strides = [1, 1]} : vector<8x64xf32> to vector<8x32xf32>
    %235 = vector.extract_strided_slice %227 {offsets = [0, 32], sizes = [8, 32], strides = [1, 1]} : vector<8x64xf32> to vector<8x32xf32>
    %236 = arith.subf %235, %234 : vector<8x32xf32>
    %237 = arith.mulf %233, %236 : vector<8x32xf32>
    %238 = arith.addf %234, %237 : vector<8x32xf32>
    %239 = arith.index_cast %214 : i32 to index
    %c0_79 = arith.constant 0 : index
    %240 = vector.load %arg7[%239, %c0_79] : memref<64x32xf32, #tpu.memory_space<vmem>>, vector<8x32xf32>
    tpu.vector_store %arg7[%239, %c0_79], %238 {strides = array<i32>} : memref<64x32xf32, #tpu.memory_space<vmem>>, vector<8x32xf32>,
    %c8_i32_80 = arith.constant 8 : i32
    %c0_81 = arith.constant 0 : index
    %c0_82 = arith.constant 0 : index
    %241 = vector.load %arg10[%c0_81, %c0_82] : memref<8x32xf32, #tpu.memory_space<vmem>>, vector<8x32xf32>
    tpu.vector_store %arg10[%c0_81, %c0_82], %238 {strides = array<i32>} : memref<8x32xf32, #tpu.memory_space<vmem>>, vector<8x32xf32>,
    %c0_83 = arith.constant 0 : index
    %c0_84 = arith.constant 0 : index
    %242 = vector.load %arg8[%c0_83, %c0_84] : memref<8x32xf32, #tpu.memory_space<vmem>>, vector<8x32xf32>
    tpu.vector_store %arg8[%c0_83, %c0_84], %238 {strides = array<i32>} : memref<8x32xf32, #tpu.memory_space<vmem>>, vector<8x32xf32>,
    return
  }
  func.func @transform_0(%arg0: i32) -> (i32, i32) {
    %c0_i32 = arith.constant 0 : i32
    %c0_i32_0 = arith.constant 0 : i32
    return %arg0, %c0_i32 : i32, i32
  }
  func.func @transform_1(%arg0: i32) -> (i32, i32) {
    %c0_i32 = arith.constant 0 : i32
    %c0_i32_0 = arith.constant 0 : i32
    %c0_i32_1 = arith.constant 0 : i32
    return %c0_i32, %c0_i32_0 : i32, i32
  }
  func.func @transform_2(%arg0: i32) -> (i32, i32) {
    %c0_i32 = arith.constant 0 : i32
    %c0_i32_0 = arith.constant 0 : i32
    %c0_i32_1 = arith.constant 0 : i32
    return %c0_i32, %c0_i32_0 : i32, i32
  }
  func.func @transform_3(%arg0: i32) -> (i32, i32) {
    %c0_i32 = arith.constant 0 : i32
    %c0_i32_0 = arith.constant 0 : i32
    %c0_i32_1 = arith.constant 0 : i32
    return %c0_i32, %c0_i32_0 : i32, i32
  }
  func.func @transform_4(%arg0: i32) -> (i32, i32) {
    %c0_i32 = arith.constant 0 : i32
    %c0_i32_0 = arith.constant 0 : i32
    %c0_i32_1 = arith.constant 0 : i32
    return %c0_i32, %c0_i32_0 : i32, i32
  }
  func.func @transform_5(%arg0: i32) -> (i32, i32) {
    %c0_i32 = arith.constant 0 : i32
    %c0_i32_0 = arith.constant 0 : i32
    %c0_i32_1 = arith.constant 0 : i32
    return %c0_i32, %c0_i32_0 : i32, i32
  }
  func.func @transform_6(%arg0: i32) -> (i32, i32) {
    %c0_i32 = arith.constant 0 : i32
    %c0_i32_0 = arith.constant 0 : i32
    return %arg0, %c0_i32 : i32, i32
  }
  func.func @transform_7(%arg0: i32) -> (i32, i32) {
    %c0_i32 = arith.constant 0 : i32
    %c0_i32_0 = arith.constant 0 : i32
    %c0_i32_1 = arith.constant 0 : i32
    return %c0_i32, %c0_i32_0 : i32, i32
  }
}

</mosaic_0001>

<bundles_post_ra>
// kernel: cfc_forward.1
= control target key start
LH: loop header
LB: loop body
LE: loop exit
PB: predicated region body
PF: predicated region fallthrough
CT: control target
= control target key end

     0   :  { %vm69_vm0 = vcmask 1043456   ;;  %vm44_vm1 = vcmask 31744   ;;  %vm29_vm2 = vcmask 261120   ;;  %v945_v3 = vmov 0.0   ;;  %s946_s20 = smov 32   ;;  %s1388_s2 = inlined_call_operand.vmem [shape: f32[32,128], index: 2, kind: input, shape index: {}]   ;;  %s1389_s1 = inlined_call_operand.vmem [shape: f32[4,128], index: 1, kind: input, shape index: {}]   ;;  %s1390_s0 = inlined_call_operand.vmem [shape: f32[64,4], index: 0, kind: input, shape index: {}]   ;;  %s1391_s4 = inlined_call_operand.vmem [shape: f32[128,96], index: 4, kind: input, shape index: {}]   ;;  %s1392_s3 = inlined_call_operand.vmem [shape: f32[1,128], index: 3, kind: input, shape index: {}]   ;;  %s1393_s5 = inlined_call_operand.vmem [shape: f32[1,96], index: 5, kind: input, shape index: {}]   ;;  %s1394_s6 = inlined_call_operand.vmem [shape: f32[64,32], index: 6, kind: output, shape index: {0}]   ;;  %s1395_s7 = inlined_call_operand.vmem [shape: f32[8,32], index: 7, kind: output, shape index: {1}]  }
   0x1   :  { %v991_v0 = vld [vmem:[%s1388_s2 + $0x18] sm:$0xff]  ;;  %v996_v1 = vld [vmem:[%s1388_s2 + $0x10] sm:$0xff]  ;;  %v39_v2 = vld [vmem:[%s1389_s1] sm:$0xf]  ;;  %30 = vst.msk [vmem:[#allocation3] sm:$0xff] %vm29_vm2, %v945_v3 }
   0x2   :  { %164 = vmatpush.msra.mxu1 %v991_v0  ;;  %844 = vmatpush.msk.msra.mxu0 %vm69_vm0, %v39_v2  ;;  %v31_v4 = vld [vmem:[%s1390_s0] sm:$0xff]  ;;  %v1009_v5 = vld [vmem:[%s1388_s2 + $0x8] sm:$0xff]  ;;  %v1015_v6 = vld [vmem:[%s1391_s4 + $0x78] sm:$0xff] }
   0x3   :  { %845 = vmatmul.msk.f32.vlgmr.msra.gmra.mxu0 %vm44_vm1, %v31_v4  ;;  %v1020_v7 = vld [vmem:[%s1391_s4 + $0x70] sm:$0xff]  ;;  %249 = vmatpush.msra.mxu3 %v991_v0  ;;  %v1028_v8 = vld [vmem:[%s1388_s2] sm:$0xff]  ;;  %v1033_v9 = vld [vmem:[%s1391_s4 + $0x68] sm:$0xff] }
   0x4   :  { %165 = vmatpush.msra.mxu1 %v996_v1  ;;  %176 = vmatpush.msra.mxu2 %v1015_v6  ;;  %v1042_v10 = vld [vmem:[%s1391_s4 + $0x60] sm:$0xff]  ;;  %v1052_v12 = vld [vmem:[%s1391_s4 + $0x58] sm:$0xff]  ;;  %v1060_v13 = vld [vmem:[%s1391_s4 + $0x50] sm:$0xff] }
   0x5   :  { %250 = vmatpush.msra.mxu3 %v996_v1  ;;  %433 = vmatpush.msrb.mxu0 %v1015_v6  ;;  %v1069_v14 = vld [vmem:[%s1391_s4 + $0x48] sm:$0xff]  ;;  %v1078_v15 = vld [vmem:[%s1391_s4 + $0x40] sm:$0xff]  ;;  %v1096_v16 = vld [vmem:[%s1391_s4 + $0x38] sm:$0xff] }
   0x6   :  { %166 = vmatpush.msra.mxu1 %v1009_v5  ;;  %177 = vmatpush.msra.mxu2 %v1020_v7  ;;  %v1104_v17 = vld [vmem:[%s1391_s4 + $0x30] sm:$0xff]  ;;  %v1111_v18 = vld [vmem:[%s1391_s4 + $0x28] sm:$0xff]  ;;  %v1119_v19 = vld [vmem:[%s1391_s4 + $0x20] sm:$0xff] }
   0x7   :  { %251 = vmatpush.msra.mxu3 %v1009_v5  ;;  %434 = vmatpush.msrb.mxu0 %v1020_v7  ;;  %v1126_v20 = vld [vmem:[%s1391_s4 + $0x18] sm:$0xff]  ;;  %v1132_v21 = vld [vmem:[%s1391_s4 + $0x10] sm:$0xff]  ;;  %v1140_v22 = vld [vmem:[%s1391_s4 + $0x8] sm:$0xff] }
   0x8   :  { %167 = vmatpush.msra.mxu1 %v1028_v8  ;;  %v146_v11 = vld [vmem:[#allocation3] sm:$0xff]  ;;  %178 = vmatpush.msra.mxu2 %v1033_v9  ;;  %v32_v53 = vld [vmem:[%s1390_s0 + $0x8] sm:$0xff] }
   0x9   :  { %853 = vmatmul.msk.f32.vlgmr.msra.gmra.mxu1 %vm29_vm2, %v146_v11  ;;  %252 = vmatpush.msra.mxu3 %v1028_v8  ;;  %v1148_v23 = vld [vmem:[%s1391_s4] sm:$0xff] }
   0xa   :  { %179 = vmatpush.msra.mxu2 %v1042_v10  ;;  %261 = vmatpush.msrb.mxu1 %v1015_v6  ;;  %v1172_v24 = vld [vmem:[%s1392_s3] ss:$0 sm:$0xff] }
   0xb   :  { %335 = vmatpush.msrb.mxu3 %v991_v0  ;;  %435 = vmatpush.msrb.mxu0 %v1033_v9  ;;  %v1194_v32 = vld [vmem:[%s1393_s5] ss:$0 sm:$0xff]  ;;  %s947_s5 = smov 64  }
   0xc   :  { %180 = vmatpush.msra.mxu2 %v1052_v12  ;;  %262 = vmatpush.msrb.mxu1 %v1020_v7 }
   0xd   :  { %336 = vmatpush.msrb.mxu3 %v996_v1  ;;  %436 = vmatpush.msrb.mxu0 %v1042_v10 }
   0xe   :  { %181 = vmatpush.msra.mxu2 %v1060_v13  ;;  %263 = vmatpush.msrb.mxu1 %v1033_v9 }
   0xf   :  { %337 = vmatpush.msrb.mxu3 %v1009_v5  ;;  %437 = vmatpush.msrb.mxu0 %v1052_v12 }
  0x10   :  { %182 = vmatpush.msra.mxu2 %v1069_v14  ;;  %264 = vmatpush.msrb.mxu1 %v1042_v10 }
  0x11   :  { %338 = vmatpush.msrb.mxu3 %v1028_v8  ;;  %438 = vmatpush.msrb.mxu0 %v1060_v13 }
  0x12   :  { %183 = vmatpush.msra.mxu2 %v1078_v15  ;;  %265 = vmatpush.msrb.mxu1 %v1052_v12 }
  0x13   :  { %439 = vmatpush.msrb.mxu0 %v1069_v14 }
  0x14   :  { %266 = vmatpush.msrb.mxu1 %v1060_v13  ;;  %184 = vmatpush.msra.mxu2 %v1096_v16 }
  0x15   :  { %440 = vmatpush.msrb.mxu0 %v1078_v15 }
  0x16   :  { %267 = vmatpush.msrb.mxu1 %v1069_v14  ;;  %185 = vmatpush.msra.mxu2 %v1104_v17 }
  0x17   :  { %441 = vmatpush.msrb.mxu0 %v1096_v16 }
  0x18   :  { %268 = vmatpush.msrb.mxu1 %v1078_v15  ;;  %186 = vmatpush.msra.mxu2 %v1111_v18 }
  0x19   :  { %442 = vmatpush.msrb.mxu0 %v1104_v17 }
  0x1a   :  { %269 = vmatpush.msrb.mxu1 %v1096_v16  ;;  %187 = vmatpush.msra.mxu2 %v1119_v19 }
  0x1b   :  { %443 = vmatpush.msrb.mxu0 %v1111_v18 }
  0x1c   :  { %270 = vmatpush.msrb.mxu1 %v1104_v17  ;;  %188 = vmatpush.msra.mxu2 %v1126_v20 }
  0x1d   :  { %444 = vmatpush.msrb.mxu0 %v1119_v19 }
  0x1e   :  { %271 = vmatpush.msrb.mxu1 %v1111_v18  ;;  %189 = vmatpush.msra.mxu2 %v1132_v21 }
  0x1f   :  { %445 = vmatpush.msrb.mxu0 %v1126_v20 }
  0x20   :  { %272 = vmatpush.msrb.mxu1 %v1119_v19  ;;  %190 = vmatpush.msra.mxu2 %v1140_v22 }
  0x21   :  { %446 = vmatpush.msrb.mxu0 %v1132_v21 }
  0x22   :  { %273 = vmatpush.msrb.mxu1 %v1126_v20  ;;  %191 = vmatpush.msra.mxu2 %v1148_v23 }
  0x23   :  { %447 = vmatpush.msrb.mxu0 %v1140_v22 }
  0x24   :  { %274 = vmatpush.msrb.mxu1 %v1132_v21  ;;  %421 = vmatpush.msrb.mxu2 %v991_v0 }
  0x25   :  { %448 = vmatpush.msrb.mxu0 %v1148_v23 }
  0x26   :  { %275 = vmatpush.msrb.mxu1 %v1140_v22  ;;  %422 = vmatpush.msrb.mxu2 %v996_v1 }
  0x27   :  { %765 = vmatpush.msra.mxu0 %v991_v0 }
  0x28   :  { %276 = vmatpush.msrb.mxu1 %v1148_v23  ;;  %423 = vmatpush.msrb.mxu2 %v1009_v5 }
  0x29   :  { %766 = vmatpush.msra.mxu0 %v996_v1 }
  0x2a   :  { %507 = vmatpush.msra.mxu1 %v991_v0  ;;  %424 = vmatpush.msrb.mxu2 %v1028_v8 }
  0x2b   :  { %767 = vmatpush.msra.mxu0 %v1009_v5 }
  0x2c   :  { %508 = vmatpush.msra.mxu1 %v996_v1  ;;  %846 = vmatmul.msk.f32.gmra.mxu0 %vm44_vm1, %v32_v53 }
  0x2d   :  { %768 = vmatpush.msra.mxu0 %v1028_v8 }
  0x2e   :  { %509 = vmatpush.msra.mxu1 %v1009_v5 }
  0x30   :  { %510 = vmatpush.msra.mxu1 %v1028_v8 }
  0x80   :  { %v90_v25 = vpop.f32.mrf.mxu0 }
  0x81   :  { %v91_v26 = vadd.f32 %v1172_v24, %v90_v25 }
  0x86   :  { %v169_v27 = vpop.f32.mrf.mxu1 }
  0x87   :  { %v172_v28 = vadd.f32 %v169_v27, %v91_v26 }
  0x89   :  { %v173_v29 = vmul.f32 0.666, %v172_v28 }
  0x8b   :  { %881 = vtanh.f32 %v173_v29 }
  0x91   :  { %v882_v30 = vpop.eup %881 }
  0x92   :  { %v175_v31 = vmul.f32 1.7159, %v882_v30 }
  0x94   :  { %192 = vmatmul.f32.vlgmr.msra.gmra.mxu2 %v175_v31 }
  0x95   :  { %519 = vmatpush.msra.mxu2 %v1015_v6 }
  0x97   :  { %520 = vmatpush.msra.mxu2 %v1020_v7 }
  0x99   :  { %521 = vmatpush.msra.mxu2 %v1033_v9 }
  0x9b   :  { %522 = vmatpush.msra.mxu2 %v1042_v10 }
  0x9d   :  { %523 = vmatpush.msra.mxu2 %v1052_v12 }
  0x9f   :  { %524 = vmatpush.msra.mxu2 %v1060_v13 }
  0xa1   :  { %525 = vmatpush.msra.mxu2 %v1069_v14 }
  0xa3   :  { %526 = vmatpush.msra.mxu2 %v1078_v15 }
  0xa5   :  { %527 = vmatpush.msra.mxu2 %v1096_v16 }
  0xa7   :  { %528 = vmatpush.msra.mxu2 %v1104_v17 }
  0xa9   :  { %529 = vmatpush.msra.mxu2 %v1111_v18  ;;  %v93_v56 = vpop.f32.mrf.mxu0 }
  0xaa   :  { %v94_v57 = vadd.f32 %v1172_v24, %v93_v56 }
  0xab   :  { %530 = vmatpush.msra.mxu2 %v1119_v19 }
  0xad   :  { %531 = vmatpush.msra.mxu2 %v1126_v20 }
  0xaf   :  { %532 = vmatpush.msra.mxu2 %v1132_v21 }
  0xb1   :  { %533 = vmatpush.msra.mxu2 %v1140_v22 }
  0xb3   :  { %534 = vmatpush.msra.mxu2 %v1148_v23 }
 0x117   :  { %v193_v33 = vpop.f32.mrf.mxu2 }
 0x118   :  { %v194_v34 = vadd.f32 %v1194_v32, %v193_v33 }
 0x11a   :  { %883 = vtanh.f32 %v194_v34  ;;  %v854_v38 = vmul.f32 -1.442695, %v194_v34 }
 0x11c   :  { %885 = vpow2.f32 %v854_v38 }
 0x120   :  { %v884_v35 = vpop.eup %883 }
 0x121   :  { %217 = vrot.lane.b32.xlu0 %v884_v35, %s946_s20 }
 0x122   :  { %v886_v39 = vpop.eup %885 }
 0x123   :  { %v200_v40 = vadd.f32 1.0, %v886_v39 }
 0x125   :  { %887 = vrcp.f32 %v200_v40  ;;  %v212_v46 = vand.u32 2147483648, %v200_v40  ;;  %vm206_vm4 = vweird.f32 %v200_v40  ;;  %v210_v47 = vand.u32 2147483647, %v200_v40 }
 0x127   :  { %v213_v49 = vor.u32 1.1754944e-38, %v212_v46  ;;  %vm211_vm6 = vcmp.eq.f32.partialorder %v210_v47, 8.507059e+37 }
 0x12b   :  { %v888_v41 = vpop.eup %887 }
 0x12c   :  { %v202_v42 = vmul.f32 %v888_v41, %v200_v40  ;;  %vm207_vm3 = vweird.f32 %v888_v41 }
 0x12d   :  { %vm208_vm5 = vmor %vm206_vm4, %vm207_vm3 }
 0x12e   :  { %v203_v43 = vsub.f32 1.0, %v202_v42 }
 0x130   :  { %v204_v44 = vmul.f32 %v888_v41, %v203_v43 }
 0x132   :  { %v205_v45 = vadd.f32 %v888_v41, %v204_v44 }
 0x134   :  { %v209_v48 = vsel %vm208_vm5, %v888_v41, %v205_v45  ;;  %v33_v41 = vld [vmem:[%s1390_s0 + $0x10] sm:$0xff] }
 0x135   :  { %v214_v50 = vsel %vm211_vm6, %v213_v49, %v209_v48  ;;  %847 = vmatmul.msk.f32.gmra.mxu0 %vm44_vm1, %v33_v41 }
 0x193   :  { %v218_v36 = vpop.permute.xlu0 %217 }
 0x194   :  { %v220_v37 = vsub.f32 %v884_v35, %v218_v36 }
 0x196   :  { %222 = vrot.lane.b32.xlu0 %v220_v37, %s946_s20 }
 0x1b2   :  { %v96_v44 = vpop.f32.mrf.mxu0 }
 0x1b3   :  { %v97_v45 = vadd.f32 %v1172_v24, %v96_v44 }
 0x208   :  { %v223_v51 = vpop.permute.xlu0 %222 }
 0x209   :  { %v225_v52 = vmul.f32 %v223_v51, %v214_v50 }
 0x20b   :  { %227 = vrot.lane.b32.xlu1 %v225_v52, %s947_s5 }
 0x27d   :  { %v228_v54 = vpop.permute.xlu1 %227 }
 0x27e   :  { %v230_v55 = vadd.f32 %v884_v35, %v228_v54 }
 0x280   :  { %231 = vst.msk [vmem:[%s1394_s6] sm:$0xff] %vm29_vm2, %v230_v55  ;;  %855 = vmatmul.msk.f32.vlgmr.msra.gmra.mxu3 %vm29_vm2, %v230_v55 }
 0x281   :  { %347 = vmatpush.msra.mxu3 %v1015_v6 }
 0x283   :  { %348 = vmatpush.msra.mxu3 %v1020_v7 }
 0x285   :  { %349 = vmatpush.msra.mxu3 %v1033_v9 }
 0x287   :  { %350 = vmatpush.msra.mxu3 %v1042_v10 }
 0x289   :  { %351 = vmatpush.msra.mxu3 %v1052_v12 }
 0x28b   :  { %352 = vmatpush.msra.mxu3 %v1060_v13 }
 0x28d   :  { %353 = vmatpush.msra.mxu3 %v1069_v14 }
 0x28f   :  { %354 = vmatpush.msra.mxu3 %v1078_v15 }
 0x291   :  { %355 = vmatpush.msra.mxu3 %v1096_v16 }
 0x293   :  { %356 = vmatpush.msra.mxu3 %v1104_v17 }
 0x295   :  { %357 = vmatpush.msra.mxu3 %v1111_v18 }
 0x297   :  { %358 = vmatpush.msra.mxu3 %v1119_v19 }
 0x299   :  { %359 = vmatpush.msra.mxu3 %v1126_v20 }
 0x29b   :  { %360 = vmatpush.msra.mxu3 %v1132_v21 }
 0x29d   :  { %361 = vmatpush.msra.mxu3 %v1140_v22 }
 0x29f   :  { %362 = vmatpush.msra.mxu3 %v1148_v23 }
 0x303   :  { %v254_v58 = vpop.f32.mrf.mxu3 }
 0x304   :  { %v257_v59 = vadd.f32 %v254_v58, %v94_v57 }
 0x306   :  { %v258_v60 = vmul.f32 0.666, %v257_v59 }
 0x308   :  { %889 = vtanh.f32 %v258_v60 }
 0x30e   :  { %v890_v61 = vpop.eup %889 }
 0x30f   :  { %v260_v62 = vmul.f32 1.7159, %v890_v61 }
 0x311   :  { %277 = vmatmul.f32.vlgmr.msrb.gmra.mxu1 %v260_v62 }
 0x312   :  { %593 = vmatpush.msrb.mxu1 %v991_v0 }
 0x314   :  { %594 = vmatpush.msrb.mxu1 %v996_v1 }
 0x316   :  { %595 = vmatpush.msrb.mxu1 %v1009_v5 }
 0x318   :  { %596 = vmatpush.msrb.mxu1 %v1028_v8 }
 0x38e   :  { %v278_v63 = vpop.f32.mrf.mxu1 }
 0x38f   :  { %v279_v2 = vadd.f32 %v1194_v32, %v278_v63 }
 0x391   :  { %891 = vtanh.f32 %v279_v2  ;;  %v856_v25 = vmul.f32 -1.442695, %v279_v2 }
 0x393   :  { %893 = vpow2.f32 %v856_v25 }
 0x397   :  { %v892_v3 = vpop.eup %891 }
 0x398   :  { %302 = vrot.lane.b32.xlu1 %v892_v3, %s946_s20 }
 0x399   :  { %v894_v26 = vpop.eup %893 }
 0x39a   :  { %v285_v27 = vadd.f32 1.0, %v894_v26 }
 0x39c   :  { %895 = vrcp.f32 %v285_v27  ;;  %v297_v34 = vand.u32 2147483648, %v285_v27  ;;  %vm291_vm8 = vweird.f32 %v285_v27  ;;  %v295_v35 = vand.u32 2147483647, %v285_v27 }
 0x39e   :  { %v298_v37 = vor.u32 1.1754944e-38, %v297_v34  ;;  %vm296_vm10 = vcmp.eq.f32.partialorder %v295_v35, 8.507059e+37  ;;  %v37_v34 = vld [vmem:[%s1390_s0 + $0x30] sm:$0xff]  ;;  %v38_v35 = vld [vmem:[%s1390_s0 + $0x38] sm:$0xff] }
 0x3a2   :  { %v896_v28 = vpop.eup %895 }
 0x3a3   :  { %v287_v29 = vmul.f32 %v896_v28, %v285_v27  ;;  %vm292_vm7 = vweird.f32 %v896_v28 }
 0x3a4   :  { %vm293_vm9 = vmor %vm291_vm8, %vm292_vm7 }
 0x3a5   :  { %v288_v30 = vsub.f32 1.0, %v287_v29  ;;  %v35_v29 = vld [vmem:[%s1390_s0 + $0x20] sm:$0xff] }
 0x3a7   :  { %v289_v31 = vmul.f32 %v896_v28, %v288_v30  ;;  %v36_v30 = vld [vmem:[%s1390_s0 + $0x28] sm:$0xff] }
 0x3a9   :  { %v290_v33 = vadd.f32 %v896_v28, %v289_v31 }
 0x3ab   :  { %v294_v36 = vsel %vm293_vm9, %v896_v28, %v290_v33  ;;  %v34_v28 = vld [vmem:[%s1390_s0 + $0x18] sm:$0xff] }
 0x3ac   :  { %v299_v38 = vsel %vm296_vm10, %v298_v37, %v294_v36  ;;  %848 = vmatmul.msk.f32.gmra.mxu0 %vm44_vm1, %v34_v28 }
 0x3b4   :  { %849 = vmatmul.msk.f32.gmra.mxu0 %vm44_vm1, %v35_v29 }
 0x3bc   :  { %850 = vmatmul.msk.f32.gmra.mxu0 %vm44_vm1, %v36_v30 }
 0x3c4   :  { %851 = vmatmul.msk.f32.gmra.mxu0 %vm44_vm1, %v37_v34 }
 0x3cc   :  { %852 = vmatmul.msk.f32.gmra.mxu0 %vm44_vm1, %v38_v35 }
 0x40a   :  { %v303_v4 = vpop.permute.xlu1 %302 }
 0x40b   :  { %v305_v11 = vsub.f32 %v892_v3, %v303_v4 }
 0x40d   :  { %307 = vrot.lane.b32.xlu2 %v305_v11, %s946_s20 }
 0x429   :  { %v99_v36 = vpop.f32.mrf.mxu0 }
 0x42a   :  { %v100_v37 = vadd.f32 %v1172_v24, %v99_v36 }
 0x467   :  { %v308_v39 = vpop.permute.xlu2 %307 }
 0x468   :  { %v310_v40 = vmul.f32 %v308_v39, %v299_v38 }
 0x46a   :  { %312 = vrot.lane.b32.xlu2 %v310_v40, %s947_s5 }
 0x4c4   :  { %v313_v42 = vpop.permute.xlu2 %312 }
 0x4c5   :  { %v315_v43 = vadd.f32 %v892_v3, %v313_v42 }
 0x4c7   :  { %857 = vst.msk [vmem:[%s1394_s6 + $0x8] sm:$0xff] %vm29_vm2, %v315_v43  ;;  %858 = vmatmul.msk.f32.vlgmr.msrb.gmra.mxu3 %vm29_vm2, %v315_v43  ;;  %v102_v43 = vpop.f32.mrf.mxu0 }
 0x4c8   :  { %605 = vmatpush.msrb.mxu3 %v1015_v6 }
 0x4ca   :  { %606 = vmatpush.msrb.mxu3 %v1020_v7 }
 0x4cc   :  { %607 = vmatpush.msrb.mxu3 %v1033_v9 }
 0x4ce   :  { %608 = vmatpush.msrb.mxu3 %v1042_v10 }
 0x4cf   :  { %v1306_v44 = vpop.f32.mrf.mxu0 }
 0x4d0   :  { %609 = vmatpush.msrb.mxu3 %v1052_v12 }
 0x4d2   :  { %610 = vmatpush.msrb.mxu3 %v1060_v13 }
 0x4d4   :  { %611 = vmatpush.msrb.mxu3 %v1069_v14 }
 0x4d6   :  { %612 = vmatpush.msrb.mxu3 %v1078_v15 }
 0x4d8   :  { %613 = vmatpush.msrb.mxu3 %v1096_v16 }
 0x4da   :  { %614 = vmatpush.msrb.mxu3 %v1104_v17 }
 0x4dc   :  { %615 = vmatpush.msrb.mxu3 %v1111_v18 }
 0x4de   :  { %616 = vmatpush.msrb.mxu3 %v1119_v19 }
 0x4e0   :  { %617 = vmatpush.msrb.mxu3 %v1126_v20 }
 0x4e2   :  { %618 = vmatpush.msrb.mxu3 %v1132_v21 }
 0x4e4   :  { %619 = vmatpush.msrb.mxu3 %v1140_v22 }
 0x4e6   :  { %620 = vmatpush.msrb.mxu3 %v1148_v23 }
 0x54a   :  { %v340_v46 = vpop.f32.mrf.mxu3 }
 0x54b   :  { %v343_v47 = vadd.f32 %v340_v46, %v97_v45  ;;  %v1308_v45 = vpop.f32.mrf.mxu0 }
 0x54d   :  { %v344_v48 = vmul.f32 0.666, %v343_v47 }
 0x54f   :  { %897 = vtanh.f32 %v344_v48 }
 0x553   :  { %v1310_v46 = vpop.f32.mrf.mxu0 }
 0x555   :  { %v898_v49 = vpop.eup %897 }
 0x556   :  { %v346_v50 = vmul.f32 1.7159, %v898_v49 }
 0x558   :  { %363 = vmatmul.f32.vlgmr.msra.gmra.mxu3 %v346_v50 }
 0x5db   :  { %v364_v51 = vpop.f32.mrf.mxu3 }
 0x5dc   :  { %v365_v52 = vadd.f32 %v1194_v32, %v364_v51 }
 0x5de   :  { %899 = vtanh.f32 %v365_v52  ;;  %v859_v56 = vmul.f32 -1.442695, %v365_v52 }
 0x5e0   :  { %901 = vpow2.f32 %v859_v56 }
 0x5e4   :  { %v900_v53 = vpop.eup %899 }
 0x5e5   :  { %388 = vrot.lane.b32.xlu0 %v900_v53, %s946_s20 }
 0x5e6   :  { %v902_v57 = vpop.eup %901 }
 0x5e7   :  { %v371_v58 = vadd.f32 1.0, %v902_v57 }
 0x5e9   :  { %903 = vrcp.f32 %v371_v58  ;;  %v383_v2 = vand.u32 2147483648, %v371_v58  ;;  %vm377_vm12 = vweird.f32 %v371_v58  ;;  %v381_v3 = vand.u32 2147483647, %v371_v58 }
 0x5eb   :  { %v384_v11 = vor.u32 1.1754944e-38, %v383_v2  ;;  %vm382_vm14 = vcmp.eq.f32.partialorder %v381_v3, 8.507059e+37 }
 0x5ef   :  { %v904_v59 = vpop.eup %903 }
 0x5f0   :  { %v373_v60 = vmul.f32 %v904_v59, %v371_v58  ;;  %vm378_vm11 = vweird.f32 %v904_v59 }
 0x5f1   :  { %vm379_vm13 = vmor %vm377_vm12, %vm378_vm11 }
 0x5f2   :  { %v374_v61 = vsub.f32 1.0, %v373_v60 }
 0x5f4   :  { %v375_v62 = vmul.f32 %v904_v59, %v374_v61 }
 0x5f6   :  { %v376_v63 = vadd.f32 %v904_v59, %v375_v62 }
 0x5f8   :  { %v380_v4 = vsel %vm379_vm13, %v904_v59, %v376_v63 }
 0x5f9   :  { %v385_v25 = vsel %vm382_vm14, %v384_v11, %v380_v4 }
 0x657   :  { %v389_v54 = vpop.permute.xlu0 %388 }
 0x658   :  { %v391_v55 = vsub.f32 %v900_v53, %v389_v54 }
 0x65a   :  { %393 = vrot.lane.b32.xlu1 %v391_v55, %s946_s20 }
 0x6cc   :  { %v394_v26 = vpop.permute.xlu1 %393 }
 0x6cd   :  { %v396_v27 = vmul.f32 %v394_v26, %v385_v25  ;;  %v103_v26 = vadd.f32 %v1172_v24, %v102_v43 }
 0x6cf   :  { %398 = vrot.lane.b32.xlu2 %v396_v27, %s947_s5 }
 0x729   :  { %v399_v31 = vpop.permute.xlu2 %398 }
 0x72a   :  { %v401_v33 = vadd.f32 %v900_v53, %v399_v31 }
 0x72c   :  { %860 = vst.msk [vmem:[%s1394_s6 + $0x10] sm:$0xff] %vm29_vm2, %v401_v33  ;;  %861 = vmatmul.msk.f32.vlgmr.msrb.gmra.mxu2 %vm29_vm2, %v401_v33 }
 0x72d   :  { %777 = vmatpush.msrb.mxu2 %v1015_v6 }
 0x72f   :  { %778 = vmatpush.msrb.mxu2 %v1020_v7 }
 0x731   :  { %779 = vmatpush.msrb.mxu2 %v1033_v9 }
 0x733   :  { %780 = vmatpush.msrb.mxu2 %v1042_v10 }
 0x735   :  { %781 = vmatpush.msrb.mxu2 %v1052_v12 }
 0x737   :  { %782 = vmatpush.msrb.mxu2 %v1060_v13 }
 0x739   :  { %783 = vmatpush.msrb.mxu2 %v1069_v14 }
 0x73b   :  { %784 = vmatpush.msrb.mxu2 %v1078_v15 }
 0x73d   :  { %785 = vmatpush.msrb.mxu2 %v1096_v16 }
 0x73f   :  { %786 = vmatpush.msrb.mxu2 %v1104_v17 }
 0x741   :  { %787 = vmatpush.msrb.mxu2 %v1111_v18 }
 0x743   :  { %788 = vmatpush.msrb.mxu2 %v1119_v19 }
 0x745   :  { %789 = vmatpush.msrb.mxu2 %v1126_v20 }
 0x747   :  { %790 = vmatpush.msrb.mxu2 %v1132_v21 }
 0x749   :  { %791 = vmatpush.msrb.mxu2 %v1140_v22 }
 0x74b   :  { %792 = vmatpush.msrb.mxu2 %v1148_v23 }
 0x7af   :  { %v426_v38 = vpop.f32.mrf.mxu2 }
 0x7b0   :  { %v429_v39 = vadd.f32 %v426_v38, %v100_v37 }
 0x7b2   :  { %v430_v40 = vmul.f32 0.666, %v429_v39 }
 0x7b4   :  { %905 = vtanh.f32 %v430_v40 }
 0x7ba   :  { %v906_v41 = vpop.eup %905 }
 0x7bb   :  { %v432_v42 = vmul.f32 1.7159, %v906_v41 }
 0x7bd   :  { %449 = vmatmul.f32.vlgmr.msrb.gmra.mxu0 %v432_v42 }
 0x83a   :  { %v450_v47 = vpop.f32.mrf.mxu0 }
 0x83b   :  { %v451_v48 = vadd.f32 %v1194_v32, %v450_v47 }
 0x83d   :  { %907 = vtanh.f32 %v451_v48  ;;  %v862_v52 = vmul.f32 -1.442695, %v451_v48 }
 0x83f   :  { %909 = vpow2.f32 %v862_v52 }
 0x843   :  { %v908_v49 = vpop.eup %907 }
 0x844   :  { %474 = vrot.lane.b32.xlu0 %v908_v49, %s946_s20 }
 0x845   :  { %v910_v53 = vpop.eup %909 }
 0x846   :  { %v457_v54 = vadd.f32 1.0, %v910_v53 }
 0x848   :  { %911 = vrcp.f32 %v457_v54  ;;  %v469_v60 = vand.u32 2147483648, %v457_v54  ;;  %vm463_vm0 = vweird.f32 %v457_v54  ;;  %v467_v61 = vand.u32 2147483647, %v457_v54 }
 0x84a   :  { %v470_v63 = vor.u32 1.1754944e-38, %v469_v60  ;;  %vm468_vm3 = vcmp.eq.f32.partialorder %v467_v61, 8.507059e+37 }
 0x84e   :  { %v912_v55 = vpop.eup %911 }
 0x84f   :  { %v459_v56 = vmul.f32 %v912_v55, %v457_v54  ;;  %vm464_vm15 = vweird.f32 %v912_v55 }
 0x850   :  { %vm465_vm1 = vmor %vm463_vm0, %vm464_vm15 }
 0x851   :  { %v460_v57 = vsub.f32 1.0, %v459_v56 }
 0x853   :  { %v461_v58 = vmul.f32 %v912_v55, %v460_v57 }
 0x855   :  { %v462_v59 = vadd.f32 %v912_v55, %v461_v58 }
 0x857   :  { %v466_v62 = vsel %vm465_vm1, %v912_v55, %v462_v59 }
 0x858   :  { %v471_v2 = vsel %vm468_vm3, %v470_v63, %v466_v62 }
 0x8b6   :  { %v475_v50 = vpop.permute.xlu0 %474 }
 0x8b7   :  { %v477_v51 = vsub.f32 %v908_v49, %v475_v50 }
 0x8b9   :  { %479 = vrot.lane.b32.xlu1 %v477_v51, %s946_s20 }
 0x92b   :  { %v480_v3 = vpop.permute.xlu1 %479 }
 0x92c   :  { %v482_v4 = vmul.f32 %v480_v3, %v471_v2  ;;  %v109_v3 = vadd.f32 %v1172_v24, %v1308_v45 }
 0x92e   :  { %484 = vrot.lane.b32.xlu2 %v482_v4, %s947_s5 }
 0x988   :  { %v485_v11 = vpop.permute.xlu2 %484 }
 0x989   :  { %v487_v25 = vadd.f32 %v908_v49, %v485_v11 }
 0x98b   :  { %863 = vst.msk [vmem:[%s1394_s6 + $0x18] sm:$0xff] %vm29_vm2, %v487_v25  ;;  %864 = vmatmul.msk.f32.vlgmr.msra.gmra.mxu1 %vm29_vm2, %v487_v25 }
 0x98c   :  { %679 = vmatpush.msra.mxu1 %v991_v0 }
 0x98e   :  { %680 = vmatpush.msra.mxu1 %v996_v1 }
 0x990   :  { %681 = vmatpush.msra.mxu1 %v1009_v5 }
 0x992   :  { %682 = vmatpush.msra.mxu1 %v1028_v8 }
 0xa08   :  { %v512_v27 = vpop.f32.mrf.mxu1 }
 0xa09   :  { %v515_v28 = vadd.f32 %v512_v27, %v103_v26 }
 0xa0b   :  { %v516_v29 = vmul.f32 0.666, %v515_v28 }
 0xa0d   :  { %913 = vtanh.f32 %v516_v29 }
 0xa13   :  { %v914_v30 = vpop.eup %913 }
 0xa14   :  { %v518_v31 = vmul.f32 1.7159, %v914_v30 }
 0xa16   :  { %535 = vmatmul.f32.vlgmr.msra.gmra.mxu2 %v518_v31 }
 0xa99   :  { %v536_v33 = vpop.f32.mrf.mxu2 }
 0xa9a   :  { %v537_v34 = vadd.f32 %v1194_v32, %v536_v33 }
 0xa9c   :  { %915 = vtanh.f32 %v537_v34  ;;  %v865_v8 = vmul.f32 -1.442695, %v537_v34 }
 0xa9e   :  { %917 = vpow2.f32 %v865_v8 }
 0xaa2   :  { %v916_v0 = vpop.eup %915 }
 0xaa3   :  { %560 = vrot.lane.b32.xlu0 %v916_v0, %s946_s20 }
 0xaa4   :  { %v918_v35 = vpop.eup %917 }
 0xaa5   :  { %v543_v36 = vadd.f32 1.0, %v918_v35 }
 0xaa7   :  { %919 = vrcp.f32 %v543_v36  ;;  %v555_v42 = vand.u32 2147483648, %v543_v36  ;;  %vm549_vm5 = vweird.f32 %v543_v36  ;;  %v553_v43 = vand.u32 2147483647, %v543_v36 }
 0xaa9   :  { %v556_v48 = vor.u32 1.1754944e-38, %v555_v42  ;;  %vm554_vm7 = vcmp.eq.f32.partialorder %v553_v43, 8.507059e+37 }
 0xaad   :  { %v920_v37 = vpop.eup %919 }
 0xaae   :  { %v545_v38 = vmul.f32 %v920_v37, %v543_v36  ;;  %vm550_vm4 = vweird.f32 %v920_v37 }
 0xaaf   :  { %vm551_vm6 = vmor %vm549_vm5, %vm550_vm4 }
 0xab0   :  { %v546_v39 = vsub.f32 1.0, %v545_v38 }
 0xab2   :  { %v547_v40 = vmul.f32 %v920_v37, %v546_v39 }
 0xab4   :  { %v548_v41 = vadd.f32 %v920_v37, %v547_v40 }
 0xab6   :  { %v552_v47 = vsel %vm551_vm6, %v920_v37, %v548_v41 }
 0xab7   :  { %v557_v49 = vsel %vm554_vm7, %v556_v48, %v552_v47 }
 0xb15   :  { %v561_v1 = vpop.permute.xlu0 %560 }
 0xb16   :  { %v563_v5 = vsub.f32 %v916_v0, %v561_v1 }
 0xb18   :  { %565 = vrot.lane.b32.xlu1 %v563_v5, %s946_s20 }
 0xb8a   :  { %v566_v50 = vpop.permute.xlu1 %565 }
 0xb8b   :  { %v568_v51 = vmul.f32 %v566_v50, %v557_v49  ;;  %v112_v49 = vadd.f32 %v1172_v24, %v1310_v46 }
 0xb8d   :  { %570 = vrot.lane.b32.xlu2 %v568_v51, %s947_s5 }
 0xbe7   :  { %v571_v52 = vpop.permute.xlu2 %570 }
 0xbe8   :  { %v573_v53 = vadd.f32 %v916_v0, %v571_v52 }
 0xbea   :  { %866 = vst.msk [vmem:[%s1394_s6 + $0x20] sm:$0xff] %vm29_vm2, %v573_v53  ;;  %867 = vmatmul.msk.f32.vlgmr.msrb.gmra.mxu1 %vm29_vm2, %v573_v53 }
 0xbeb   :  { %691 = vmatpush.msrb.mxu1 %v1015_v6  ;;  %v106_v6 = vadd.f32 %v1172_v24, %v1306_v44 }
 0xbed   :  { %692 = vmatpush.msrb.mxu1 %v1020_v7 }
 0xbef   :  { %693 = vmatpush.msrb.mxu1 %v1033_v9 }
 0xbf1   :  { %694 = vmatpush.msrb.mxu1 %v1042_v10 }
 0xbf3   :  { %695 = vmatpush.msrb.mxu1 %v1052_v12 }
 0xbf5   :  { %696 = vmatpush.msrb.mxu1 %v1060_v13 }
 0xbf7   :  { %697 = vmatpush.msrb.mxu1 %v1069_v14 }
 0xbf9   :  { %698 = vmatpush.msrb.mxu1 %v1078_v15 }
 0xbfb   :  { %699 = vmatpush.msrb.mxu1 %v1096_v16 }
 0xbfd   :  { %700 = vmatpush.msrb.mxu1 %v1104_v17 }
 0xbff   :  { %701 = vmatpush.msrb.mxu1 %v1111_v18 }
 0xc01   :  { %702 = vmatpush.msrb.mxu1 %v1119_v19 }
 0xc03   :  { %703 = vmatpush.msrb.mxu1 %v1126_v20 }
 0xc05   :  { %704 = vmatpush.msrb.mxu1 %v1132_v21 }
 0xc07   :  { %705 = vmatpush.msrb.mxu1 %v1140_v22 }
 0xc09   :  { %706 = vmatpush.msrb.mxu1 %v1148_v23 }
 0xc67   :  { %v598_v7 = vpop.f32.mrf.mxu1 }
 0xc68   :  { %v601_v9 = vadd.f32 %v598_v7, %v106_v6 }
 0xc6a   :  { %v602_v10 = vmul.f32 0.666, %v601_v9 }
 0xc6c   :  { %921 = vtanh.f32 %v602_v10 }
 0xc72   :  { %v922_v12 = vpop.eup %921 }
 0xc73   :  { %v604_v13 = vmul.f32 1.7159, %v922_v12 }
 0xc75   :  { %621 = vmatmul.f32.vlgmr.msrb.gmra.mxu3 %v604_v13 }
 0xcf8   :  { %v622_v14 = vpop.f32.mrf.mxu3 }
 0xcf9   :  { %v623_v15 = vadd.f32 %v1194_v32, %v622_v14 }
 0xcfb   :  { %923 = vtanh.f32 %v623_v15  ;;  %v868_v19 = vmul.f32 -1.442695, %v623_v15 }
 0xcfd   :  { %925 = vpow2.f32 %v868_v19 }
 0xd01   :  { %v924_v16 = vpop.eup %923 }
 0xd02   :  { %646 = vrot.lane.b32.xlu0 %v924_v16, %s946_s20 }
 0xd03   :  { %v926_v20 = vpop.eup %925 }
 0xd04   :  { %v629_v21 = vadd.f32 1.0, %v926_v20 }
 0xd06   :  { %927 = vrcp.f32 %v629_v21  ;;  %v641_v56 = vand.u32 2147483648, %v629_v21  ;;  %vm635_vm9 = vweird.f32 %v629_v21  ;;  %v639_v57 = vand.u32 2147483647, %v629_v21 }
 0xd08   :  { %v642_v59 = vor.u32 1.1754944e-38, %v641_v56  ;;  %vm640_vm11 = vcmp.eq.f32.partialorder %v639_v57, 8.507059e+37 }
 0xd0c   :  { %v928_v22 = vpop.eup %927 }
 0xd0d   :  { %v631_v23 = vmul.f32 %v928_v22, %v629_v21  ;;  %vm636_vm8 = vweird.f32 %v928_v22 }
 0xd0e   :  { %vm637_vm10 = vmor %vm635_vm9, %vm636_vm8 }
 0xd0f   :  { %v632_v44 = vsub.f32 1.0, %v631_v23 }
 0xd11   :  { %v633_v54 = vmul.f32 %v928_v22, %v632_v44 }
 0xd13   :  { %v634_v55 = vadd.f32 %v928_v22, %v633_v54 }
 0xd15   :  { %v638_v58 = vsel %vm637_vm10, %v928_v22, %v634_v55 }
 0xd16   :  { %v643_v60 = vsel %vm640_vm11, %v642_v59, %v638_v58 }
 0xd74   :  { %v647_v17 = vpop.permute.xlu0 %646 }
 0xd75   :  { %v649_v18 = vsub.f32 %v924_v16, %v647_v17 }
 0xd77   :  { %651 = vrot.lane.b32.xlu1 %v649_v18, %s946_s20 }
 0xde9   :  { %v652_v61 = vpop.permute.xlu1 %651 }
 0xdea   :  { %v654_v62 = vmul.f32 %v652_v61, %v643_v60 }
 0xdec   :  { %656 = vrot.lane.b32.xlu2 %v654_v62, %s947_s5 }
 0xe46   :  { %v657_v63 = vpop.permute.xlu2 %656 }
 0xe47   :  { %v659_v2 = vadd.f32 %v924_v16, %v657_v63 }
 0xe49   :  { %869 = vst.msk [vmem:[%s1394_s6 + $0x28] sm:$0xff] %vm29_vm2, %v659_v2  ;;  %870 = vmatmul.msk.f32.vlgmr.msra.gmra.mxu1 %vm29_vm2, %v659_v2 }
 0xec6   :  { %v684_v4 = vpop.f32.mrf.mxu1 }
 0xec7   :  { %v687_v11 = vadd.f32 %v684_v4, %v109_v3 }
 0xec9   :  { %v688_v25 = vmul.f32 0.666, %v687_v11 }
 0xecb   :  { %929 = vtanh.f32 %v688_v25 }
 0xed1   :  { %v930_v26 = vpop.eup %929 }
 0xed2   :  { %v690_v27 = vmul.f32 1.7159, %v930_v26 }
 0xed4   :  { %707 = vmatmul.f32.vlgmr.msrb.gmra.mxu1 %v690_v27 }
 0xf51   :  { %v708_v28 = vpop.f32.mrf.mxu1 }
 0xf52   :  { %v709_v29 = vadd.f32 %v1194_v32, %v708_v28 }
 0xf54   :  { %931 = vtanh.f32 %v709_v29  ;;  %v871_v34 = vmul.f32 -1.442695, %v709_v29 }
 0xf56   :  { %933 = vpow2.f32 %v871_v34 }
 0xf5a   :  { %v932_v30 = vpop.eup %931 }
 0xf5b   :  { %732 = vrot.lane.b32.xlu0 %v932_v30, %s946_s20 }
 0xf5c   :  { %v934_v45 = vpop.eup %933 }
 0xf5d   :  { %v715_v0 = vadd.f32 1.0, %v934_v45 }
 0xf5f   :  { %935 = vrcp.f32 %v715_v0  ;;  %v727_v37 = vand.u32 2147483648, %v715_v0  ;;  %vm721_vm13 = vweird.f32 %v715_v0  ;;  %v725_v38 = vand.u32 2147483647, %v715_v0 }
 0xf61   :  { %v728_v40 = vor.u32 1.1754944e-38, %v727_v37  ;;  %vm726_vm15 = vcmp.eq.f32.partialorder %v725_v38, 8.507059e+37 }
 0xf65   :  { %v936_v1 = vpop.eup %935 }
 0xf66   :  { %v717_v5 = vmul.f32 %v936_v1, %v715_v0  ;;  %vm722_vm12 = vweird.f32 %v936_v1 }
 0xf67   :  { %vm723_vm14 = vmor %vm721_vm13, %vm722_vm12 }
 0xf68   :  { %v718_v8 = vsub.f32 1.0, %v717_v5 }
 0xf6a   :  { %v719_v35 = vmul.f32 %v936_v1, %v718_v8 }
 0xf6c   :  { %v720_v36 = vadd.f32 %v936_v1, %v719_v35 }
 0xf6e   :  { %v724_v39 = vsel %vm723_vm14, %v936_v1, %v720_v36 }
 0xf6f   :  { %v729_v41 = vsel %vm726_vm15, %v728_v40, %v724_v39 }
 0xfcd   :  { %v733_v31 = vpop.permute.xlu0 %732 }
 0xfce   :  { %v735_v33 = vsub.f32 %v932_v30, %v733_v31 }
 0xfd0   :  { %737 = vrot.lane.b32.xlu1 %v735_v33, %s946_s20 }
0x1042   :  { %v738_v42 = vpop.permute.xlu1 %737 }
0x1043   :  { %v740_v43 = vmul.f32 %v738_v42, %v729_v41 }
0x1045   :  { %742 = vrot.lane.b32.xlu2 %v740_v43, %s947_s5 }
0x109f   :  { %v743_v47 = vpop.permute.xlu2 %742 }
0x10a0   :  { %v745_v48 = vadd.f32 %v932_v30, %v743_v47 }
0x10a2   :  { %872 = vst.msk [vmem:[%s1394_s6 + $0x30] sm:$0xff] %vm29_vm2, %v745_v48  ;;  %873 = vmatmul.msk.f32.vlgmr.msra.gmra.mxu0 %vm29_vm2, %v745_v48 }
0x111f   :  { %v770_v50 = vpop.f32.mrf.mxu0 }
0x1120   :  { %v773_v51 = vadd.f32 %v770_v50, %v112_v49 }
0x1122   :  { %v774_v52 = vmul.f32 0.666, %v773_v51 }
0x1124   :  { %937 = vtanh.f32 %v774_v52 }
0x112a   :  { %v938_v53 = vpop.eup %937 }
0x112b   :  { %v776_v6 = vmul.f32 1.7159, %v938_v53 }
0x112d   :  { %793 = vmatmul.f32.vlgmr.msrb.gmra.mxu2 %v776_v6 }
0x11b0   :  { %v794_v7 = vpop.f32.mrf.mxu2 }
0x11b1   :  { %v795_v9 = vadd.f32 %v1194_v32, %v794_v7 }
0x11b3   :  { %939 = vtanh.f32 %v795_v9  ;;  %v874_v14 = vmul.f32 -1.442695, %v795_v9 }
0x11b5   :  { %941 = vpow2.f32 %v874_v14 }
0x11b9   :  { %v940_v10 = vpop.eup %939 }
0x11ba   :  { %818 = vrot.lane.b32.xlu0 %v940_v10, %s946_s20 }
0x11bb   :  { %v942_v24 = vpop.eup %941 }
0x11bc   :  { %v801_v46 = vadd.f32 1.0, %v942_v24 }
0x11be   :  { %943 = vrcp.f32 %v801_v46  ;;  %v813_v32 = vand.u32 2147483648, %v801_v46  ;;  %vm807_vm1 = vweird.f32 %v801_v46  ;;  %v811_v20 = vand.u32 2147483647, %v801_v46 }
0x11c0   :  { %v814_v22 = vor.u32 1.1754944e-38, %v813_v32  ;;  %vm812_vm4 = vcmp.eq.f32.partialorder %v811_v20, 8.507059e+37 }
0x11c4   :  { %v944_v15 = vpop.eup %943 }
0x11c5   :  { %v803_v16 = vmul.f32 %v944_v15, %v801_v46  ;;  %vm808_vm0 = vweird.f32 %v944_v15 }
0x11c6   :  { %vm809_vm3 = vmor %vm807_vm1, %vm808_vm0 }
0x11c7   :  { %v804_v17 = vsub.f32 1.0, %v803_v16 }
0x11c9   :  { %v805_v18 = vmul.f32 %v944_v15, %v804_v17 }
0x11cb   :  { %v806_v19 = vadd.f32 %v944_v15, %v805_v18 }
0x11cd   :  { %v810_v21 = vsel %vm809_vm3, %v944_v15, %v806_v19 }
0x11ce   :  { %v815_v23 = vsel %vm812_vm4, %v814_v22, %v810_v21 }
0x122c   :  { %v819_v12 = vpop.permute.xlu0 %818 }
0x122d   :  { %v821_v13 = vsub.f32 %v940_v10, %v819_v12 }
0x122f   :  { %823 = vrot.lane.b32.xlu1 %v821_v13, %s946_s20 }
0x12a1   :  { %v824_v44 = vpop.permute.xlu1 %823 }
0x12a2   :  { %v826_v54 = vmul.f32 %v824_v44, %v815_v23 }
0x12a4   :  { %828 = vrot.lane.b32.xlu2 %v826_v54, %s947_s5 }
0x12fe   :  { %v829_v55 = vpop.permute.xlu2 %828 }
0x12ff   :  { %v831_v56 = vadd.f32 %v940_v10, %v829_v55 }
0x1301   :  { %875 = vst.msk [vmem:[%s1394_s6 + $0x38] sm:$0xff] %vm29_vm2, %v831_v56 }
0x1302   :  { %834 = vst.msk [vmem:[#allocation3] sm:$0xff] %vm29_vm2, %v831_v56 }
0x1303   :  { %835 = vst.msk [vmem:[%s1395_s7] sm:$0xff] %vm29_vm2, %v831_v56 }

</bundles_post_ra>
